<compile_context>
chip_gen: v7x
topology: tpu7x:2x2x1
jax: 0.10.0
libtpu: 0.0.40
codegen_flags: <defaults>
</compile_context>

<pallas_src>
import functools

import jax
import jax.numpy as jnp
from jax.experimental import pallas as pl
from jax.experimental.pallas import tpu as pltpu


def _round_up(x, m):
    return ((x + m - 1) // m) * m


def _choose_tile(dim, max_tile, align, min_frac=2):
    """Pick (tile, padded_dim): tile <= max_tile, multiple of `align`.

    Prefers a tile that divides round_up(dim, align) so no extra padding (and
    no output slice) is needed; falls back to max_tile + padding otherwise.
    """
    padded = _round_up(dim, align)
    if padded <= max_tile:
        return padded, padded
    t = (max_tile // align) * align
    tt = t
    lo = max(align, t // min_frac)
    while tt >= lo:
        if padded % tt == 0:
            return tt, padded
        tt -= align
    return t, _round_up(padded, t)


# ---------------------------------------------------------------------------
# Kernels
# ---------------------------------------------------------------------------

def _front_kernel(z_ref, y_ref, w1z_ref, w1y_ref, b1_ref, w2_ref, b2_ref,
                  h2_ref):
    """Layers 1-2: (latent+1 -> 256 -> 512) with LeakyReLU(0.01). h2 in bf16."""
    neg_slope = jnp.float32(0.01)

    # layer1: z @ W1[:latent] + y * W1[latent] + b1  (rank-1 term for y column)
    h1 = jnp.dot(z_ref[...], w1z_ref[...], preferred_element_type=jnp.float32)
    h1 = h1 + y_ref[...] * w1y_ref[...] + b1_ref[...]
    h1 = jnp.where(h1 > 0, h1, neg_slope * h1)

    # layer2: Linear(256 -> 512), LeakyReLU(0.01)
    h2 = jnp.dot(h1.astype(jnp.bfloat16), w2_ref[...],
                 preferred_element_type=jnp.float32)
    h2 = h2 + b2_ref[...]
    h2 = jnp.where(h2 > 0, h2, neg_slope * h2)
    h2_ref[...] = h2.astype(h2_ref.dtype)


def _output_kernel(h2_ref, w3_ref, b3_ref, o_ref):
    """Output layer tile: Linear(512 -> tn) + bias, Tanh, store."""
    h3 = jnp.dot(h2_ref[...], w3_ref[...], preferred_element_type=jnp.float32)
    o_ref[...] = jnp.tanh(h3 + b3_ref[...]).astype(o_ref.dtype)


# ---------------------------------------------------------------------------
# Parameter preparation (one-time; hoisted out of the per-call path)
# ---------------------------------------------------------------------------

def prepare_generator_params(params, *, n_tile=4096):
    """Cast weights to bf16 and pre-pad W3/b3 to the N-tile grid once."""
    w1, b1, w2, b2, w3, b3 = params
    latent = w1.shape[0] - 1
    h1_dim = w1.shape[1]
    h2_dim = w2.shape[1]
    emb = w3.shape[1]

    tn, pN = _choose_tile(emb, n_tile, 128)
    w3_p, b3_p = w3, b3
    if pN != emb:
        w3_p = jnp.pad(w3_p, ((0, 0), (0, pN - emb)))
        b3_p = jnp.pad(b3_p, ((0, pN - emb),))

    prepared = {
        "w1z": jnp.asarray(w1[:latent, :], jnp.bfloat16),            # (latent, 256)
        "w1y": jnp.asarray(w1[latent:latent + 1, :], jnp.float32),   # (1, 256)
        "b1": jnp.asarray(b1, jnp.float32).reshape(1, h1_dim),
        "w2": jnp.asarray(w2, jnp.bfloat16),                         # (256, 512)
        "b2": jnp.asarray(b2, jnp.float32).reshape(1, h2_dim),
        "w3": jnp.asarray(w3_p, jnp.bfloat16),                       # (512, pN)
        "b3": jnp.asarray(b3_p, jnp.float32).reshape(1, pN),
    }
    meta = {"latent": latent, "emb": emb, "tn": tn}
    return prepared, meta


# ---------------------------------------------------------------------------
# Forward
# ---------------------------------------------------------------------------

@functools.partial(jax.jit,
                   static_argnames=("emb", "tn", "batch_tile", "out_dtype"))
def _generator_forward_impl(z, y, w1z, w1y, b1, w2, b2, w3, b3, *,
                            emb, tn, batch_tile, out_dtype):
    B, latent = z.shape
    h1_dim = w1z.shape[1]
    h2_dim = w2.shape[1]
    pN = w3.shape[1]

    tm, pB = _choose_tile(B, batch_tile, 8)

    z_bf = z.astype(jnp.bfloat16)
    y_f = y.astype(jnp.float32).reshape(B, 1)
    if pB != B:
        z_bf = jnp.pad(z_bf, ((0, pB - B), (0, 0)))
        y_f = jnp.pad(y_f, ((0, pB - B), (0, 0)))

    # ---- front kernel: layers 1-2, batch-tiled --------------------------
    h2 = pl.pallas_call(
        _front_kernel,
        out_shape=jax.ShapeDtypeStruct((pB, h2_dim), jnp.bfloat16),
        grid_spec=pltpu.PrefetchScalarGridSpec(
            num_scalar_prefetch=0,
            grid=(pB // tm,),
            in_specs=[
                pl.BlockSpec((tm, latent), lambda i: (i, 0)),      # z tile
                pl.BlockSpec((tm, 1), lambda i: (i, 0)),           # y column
                pl.BlockSpec((latent, h1_dim), lambda i: (0, 0)),  # W1[:latent]
                pl.BlockSpec((1, h1_dim), lambda i: (0, 0)),       # W1[latent]
                pl.BlockSpec((1, h1_dim), lambda i: (0, 0)),       # b1
                pl.BlockSpec((h1_dim, h2_dim), lambda i: (0, 0)),  # W2
                pl.BlockSpec((1, h2_dim), lambda i: (0, 0)),       # b2
            ],
            out_specs=pl.BlockSpec((tm, h2_dim), lambda i: (i, 0)),
        ),
        compiler_params=pltpu.CompilerParams(
            dimension_semantics=("parallel",),
        ),
    )(z_bf, y_f, w1z, w1y, b1, w2, b2)

    # ---- output kernel: streamed 512 -> emb GEMM + tanh ------------------
    # Grid = (N tiles, batch tiles) with N OUTER: each W3 tile stays resident
    # across the inner batch sweep, so W3 is read from HBM exactly once.
    # Both axes "parallel" (no carried scratch) -> megacore can split N.
    out = pl.pallas_call(
        _output_kernel,
        out_shape=jax.ShapeDtypeStruct((pB, pN), out_dtype),
        grid_spec=pltpu.PrefetchScalarGridSpec(
            num_scalar_prefetch=0,
            grid=(pN // tn, pB // tm),
            in_specs=[
                pl.BlockSpec((tm, h2_dim), lambda jn, ib: (ib, 0)),  # h2 tile
                pl.BlockSpec((h2_dim, tn), lambda jn, ib: (0, jn)),  # W3 N tile
                pl.BlockSpec((1, tn), lambda jn, ib: (0, jn)),       # b3 N tile
            ],
            out_specs=pl.BlockSpec((tm, tn), lambda jn, ib: (ib, jn)),
        ),
        compiler_params=pltpu.CompilerParams(
            dimension_semantics=("parallel", "parallel"),
            vmem_limit_bytes=48 * 1024 * 1024,
        ),
    )(h2, w3, b3)

    # Only slice when padding actually happened (avoids a full-output copy in
    # the aligned production case: B % 8 == 0, emb % tn == 0).
    if pB != B or pN != emb:
        out = out[:B, :emb]
    return out


def generator_forward(z, y, prepared, meta, *, batch_tile=512,
                      out_dtype=jnp.float32):
    """z: (B, latent_dim), y: (B,) -> (B, emb_dim)."""
    return _generator_forward_impl(
        z, y,
        prepared["w1z"], prepared["w1y"], prepared["b1"],
        prepared["w2"], prepared["b2"], prepared["w3"], prepared["b3"],
        emb=meta["emb"], tn=meta["tn"], batch_tile=batch_tile,
        out_dtype=out_dtype)


# ---------------------------------------------------------------------------
# Init / reference
# ---------------------------------------------------------------------------

def init_generator_params(key, latent_dim, emb_dim):
    """Mirror torch.nn.Linear default init: U(-1/sqrt(fan_in), 1/sqrt(fan_in)).

    Weights are stored transposed: (in_features, out_features).
    """
    dims = [(latent_dim + 1, 256), (256, 512), (512, emb_dim)]
    params = []
    for i, (fan_in, fan_out) in enumerate(dims):
        kw, kb = jax.random.split(jax.random.fold_in(key, i))
        bound = 1.0 / jnp.sqrt(jnp.float32(fan_in))
        w = jax.random.uniform(kw, (fan_in, fan_out), jnp.float32, -bound, bound)
        b = jax.random.uniform(kb, (fan_out,), jnp.float32, -bound, bound)
        params.extend([w, b])
    return tuple(params)


def generator_reference(z, y, params):
    """Plain-JAX f32 reference for correctness checking."""
    w1, b1, w2, b2, w3, b3 = params
    x = jnp.concatenate([z, y.reshape(z.shape[0], 1)], axis=1)
    h = x @ w1 + b1
    h = jnp.where(h > 0, h, 0.01 * h)
    h = h @ w2 + b2
    h = jnp.where(h > 0, h, 0.01 * h)
    h = h @ w3 + b3
    return jnp.tanh(h)


if __name__ == "__main__":
    # Small shapes consistent with the module's forward (real defaults are
    # latent_dim=512, emb_dim=512*512; scaled down but exercising batch
    # padding, N tiling (3 tiles) and emb padding).
    batch = 10
    latent_dim = 128
    emb_dim = 1500

    key = jax.random.PRNGKey(0)
    kz, ky, kp = jax.random.split(key, 3)
    z = jax.random.normal(kz, (batch, latent_dim), jnp.float32)
    y = jax.random.uniform(ky, (batch,), jnp.float32)
    params = init_generator_params(kp, latent_dim, emb_dim)

    # One-time weight prep (bf16 cast + W3/b3 padding) outside the call path.
    prepared, meta = prepare_generator_params(params, n_tile=512)

    out = generator_forward(z, y, prepared, meta, batch_tile=256)
    out = jax.block_until_ready(out)

    ref = generator_reference(z, y, params)
    assert out.shape == (batch, emb_dim), out.shape
    # bf16 weights/activations with f32 accumulation: loosened tolerance.
    max_err = float(jnp.max(jnp.abs(out - ref)))
    assert max_err < 2e-2, f"mismatch vs reference, max abs err = {max_err}"

    print("KERNEL_OK")
</pallas_src>

<mosaic_0001>
module attributes {stable_mosaic.version = 11 : i64} {
  func.func @_output_kernel(%arg0: i32, %arg1: i32, %arg2: memref<16x512xbf16, #tpu.memory_space<vmem>>, %arg3: memref<512x512xbf16, #tpu.memory_space<vmem>>, %arg4: memref<1x512xf32, #tpu.memory_space<vmem>>, %arg5: memref<16x512xf32, #tpu.memory_space<vmem>>) attributes {dimension_semantics = [#tpu.dimension_semantics<parallel>, #tpu.dimension_semantics<parallel>], iteration_bounds = array<i64: 3, 1>, scalar_prefetch = 0 : i64, scratch_operands = 0 : i64, tpu.core_type = #tpu.core_type<tc>, window_params = [{transform_indices = @transform_0, window_bounds = array<i64: 16, 512>}, {transform_indices = @transform_1, window_bounds = array<i64: 512, 512>}, {transform_indices = @transform_2, window_bounds = array<i64: 1, 512>}, {transform_indices = @transform_3, window_bounds = array<i64: 16, 512>}]} {
    %c0 = arith.constant 0 : index
    %c0_0 = arith.constant 0 : index
    %0 = vector.load %arg2[%c0, %c0_0] : memref<16x512xbf16, #tpu.memory_space<vmem>>, vector<16x512xbf16>
    %c0_1 = arith.constant 0 : index
    %c0_2 = arith.constant 0 : index
    %1 = vector.load %arg3[%c0_1, %c0_2] : memref<512x512xbf16, #tpu.memory_space<vmem>>, vector<512x512xbf16>
    %cst = arith.constant dense<0.000000e+00> : vector<16x512xf32>
    %2 = tpu.matmul %0, %1, %cst {dimension_numbers = #tpu.dot_dimension_numbers<[1], [0], [0], [1], [0, 0, 1, 1], [], []>} : vector<16x512xbf16>, vector<512x512xbf16>, vector<16x512xf32> -> vector<16x512xf32>
    %c0_3 = arith.constant 0 : index
    %c0_4 = arith.constant 0 : index
    %3 = vector.load %arg4[%c0_3, %c0_4] : memref<1x512xf32, #tpu.memory_space<vmem>>, vector<1x512xf32>
    %4 = vector.broadcast %3 : vector<1x512xf32> to vector<16x512xf32>
    %5 = arith.addf %2, %4 : vector<16x512xf32>
    %6 = math.tanh %5 : vector<16x512xf32>
    %c0_5 = arith.constant 0 : index
    %c0_6 = arith.constant 0 : index
    %7 = vector.load %arg5[%c0_5, %c0_6] : memref<16x512xf32, #tpu.memory_space<vmem>>, vector<16x512xf32>
    tpu.vector_store %arg5[%c0_5, %c0_6], %6 {strides = array<i32>} : memref<16x512xf32, #tpu.memory_space<vmem>>, vector<16x512xf32>,
    return
  }
  func.func @transform_0(%arg0: i32, %arg1: i32) -> (i32, i32) {
    %c0_i32 = arith.constant 0 : i32
    %c0_i32_0 = arith.constant 0 : i32
    return %arg1, %c0_i32 : i32, i32
  }
  func.func @transform_1(%arg0: i32, %arg1: i32) -> (i32, i32) {
    %c0_i32 = arith.constant 0 : i32
    %c0_i32_0 = arith.constant 0 : i32
    return %c0_i32, %arg0 : i32, i32
  }
  func.func @transform_2(%arg0: i32, %arg1: i32) -> (i32, i32) {
    %c0_i32 = arith.constant 0 : i32
    %c0_i32_0 = arith.constant 0 : i32
    return %c0_i32, %arg0 : i32, i32
  }
  func.func @transform_3(%arg0: i32, %arg1: i32) -> (i32, i32) {
    %c0_i32 = arith.constant 0 : i32
    return %arg1, %arg0 : i32, i32
  }
}

module attributes {stable_mosaic.version = 11 : i64} {
  func.func @_front_kernel(%arg0: i32, %arg1: memref<16x128xbf16, #tpu.memory_space<vmem>>, %arg2: memref<16x1xf32, #tpu.memory_space<vmem>>, %arg3: memref<128x256xbf16, #tpu.memory_space<vmem>>, %arg4: memref<1x256xf32, #tpu.memory_space<vmem>>, %arg5: memref<1x256xf32, #tpu.memory_space<vmem>>, %arg6: memref<256x512xbf16, #tpu.memory_space<vmem>>, %arg7: memref<1x512xf32, #tpu.memory_space<vmem>>, %arg8: memref<16x512xbf16, #tpu.memory_space<vmem>>) attributes {dimension_semantics = [#tpu.dimension_semantics<parallel>], iteration_bounds = array<i64: 1>, scalar_prefetch = 0 : i64, scratch_operands = 0 : i64, tpu.core_type = #tpu.core_type<tc>, window_params = [{transform_indices = @transform_0, window_bounds = array<i64: 16, 128>}, {transform_indices = @transform_1, window_bounds = array<i64: 16, 1>}, {pipeline_mode = #tpu.pipeline_mode<synchronous>, transform_indices = @transform_2, window_bounds = array<i64: 128, 256>}, {pipeline_mode = #tpu.pipeline_mode<synchronous>, transform_indices = @transform_3, window_bounds = array<i64: 1, 256>}, {pipeline_mode = #tpu.pipeline_mode<synchronous>, transform_indices = @transform_4, window_bounds = array<i64: 1, 256>}, {pipeline_mode = #tpu.pipeline_mode<synchronous>, transform_indices = @transform_5, window_bounds = array<i64: 256, 512>}, {pipeline_mode = #tpu.pipeline_mode<synchronous>, transform_indices = @transform_6, window_bounds = array<i64: 1, 512>}, {transform_indices = @transform_7, window_bounds = array<i64: 16, 512>}]} {
    %c0 = arith.constant 0 : index
    %c0_0 = arith.constant 0 : index
    %0 = vector.load %arg1[%c0, %c0_0] : memref<16x128xbf16, #tpu.memory_space<vmem>>, vector<16x128xbf16>
    %c0_1 = arith.constant 0 : index
    %c0_2 = arith.constant 0 : index
    %1 = vector.load %arg3[%c0_1, %c0_2] : memref<128x256xbf16, #tpu.memory_space<vmem>>, vector<128x256xbf16>
    %cst = arith.constant dense<0.000000e+00> : vector<16x256xf32>
    %2 = tpu.matmul %0, %1, %cst {dimension_numbers = #tpu.dot_dimension_numbers<[1], [0], [0], [1], [0, 0, 1, 1], [], []>} : vector<16x128xbf16>, vector<128x256xbf16>, vector<16x256xf32> -> vector<16x256xf32>
    %c0_3 = arith.constant 0 : index
    %c0_4 = arith.constant 0 : index
    %3 = vector.load %arg2[%c0_3, %c0_4] : memref<16x1xf32, #tpu.memory_space<vmem>>, vector<16x1xf32>
    %c0_5 = arith.constant 0 : index
    %c0_6 = arith.constant 0 : index
    %4 = vector.load %arg4[%c0_5, %c0_6] : memref<1x256xf32, #tpu.memory_space<vmem>>, vector<1x256xf32>
    %5 = vector.broadcast %3 : vector<16x1xf32> to vector<16x256xf32>
    %6 = vector.broadcast %4 : vector<1x256xf32> to vector<16x256xf32>
    %7 = arith.mulf %5, %6 : vector<16x256xf32>
    %8 = arith.addf %2, %7 : vector<16x256xf32>
    %c0_7 = arith.constant 0 : index
    %c0_8 = arith.constant 0 : index
    %9 = vector.load %arg5[%c0_7, %c0_8] : memref<1x256xf32, #tpu.memory_space<vmem>>, vector<1x256xf32>
    %10 = vector.broadcast %9 : vector<1x256xf32> to vector<16x256xf32>
    %11 = arith.addf %8, %10 : vector<16x256xf32>
    %cst_9 = arith.constant 0.000000e+00 : f32
    %12 = vector.broadcast %cst_9 : f32 to vector<16x256xf32>
    %13 = arith.cmpf ogt, %11, %12 : vector<16x256xf32>
    %cst_10 = arith.constant 0.00999999977 : f32
    %14 = vector.broadcast %cst_10 : f32 to vector<16x256xf32>
    %15 = arith.mulf %14, %11 : vector<16x256xf32>
    %16 = arith.select %13, %11, %15 : vector<16x256xi1>, vector<16x256xf32>
    %17 = arith.truncf %16 : vector<16x256xf32> to vector<16x256xbf16>
    %c0_11 = arith.constant 0 : index
    %c0_12 = arith.constant 0 : index
    %18 = vector.load %arg6[%c0_11, %c0_12] : memref<256x512xbf16, #tpu.memory_space<vmem>>, vector<256x512xbf16>
    %cst_13 = arith.constant dense<0.000000e+00> : vector<16x512xf32>
    %19 = tpu.matmul %17, %18, %cst_13 {dimension_numbers = #tpu.dot_dimension_numbers<[1], [0], [0], [1], [0, 0, 1, 1], [], []>} : vector<16x256xbf16>, vector<256x512xbf16>, vector<16x512xf32> -> vector<16x512xf32>
    %c0_14 = arith.constant 0 : index
    %c0_15 = arith.constant 0 : index
    %20 = vector.load %arg7[%c0_14, %c0_15] : memref<1x512xf32, #tpu.memory_space<vmem>>, vector<1x512xf32>
    %21 = vector.broadcast %20 : vector<1x512xf32> to vector<16x512xf32>
    %22 = arith.addf %19, %21 : vector<16x512xf32>
    %cst_16 = arith.constant 0.000000e+00 : f32
    %23 = vector.broadcast %cst_16 : f32 to vector<16x512xf32>
    %24 = arith.cmpf ogt, %22, %23 : vector<16x512xf32>
    %cst_17 = arith.constant 0.00999999977 : f32
    %25 = vector.broadcast %cst_17 : f32 to vector<16x512xf32>
    %26 = arith.mulf %25, %22 : vector<16x512xf32>
    %27 = arith.select %24, %22, %26 : vector<16x512xi1>, vector<16x512xf32>
    %28 = arith.truncf %27 : vector<16x512xf32> to vector<16x512xbf16>
    %c0_18 = arith.constant 0 : index
    %c0_19 = arith.constant 0 : index
    %29 = vector.load %arg8[%c0_18, %c0_19] : memref<16x512xbf16, #tpu.memory_space<vmem>>, vector<16x512xbf16>
    tpu.vector_store %arg8[%c0_18, %c0_19], %28 {strides = array<i32>} : memref<16x512xbf16, #tpu.memory_space<vmem>>, vector<16x512xbf16>,
    return
  }
  func.func @transform_0(%arg0: i32) -> (i32, i32) {
    %c0_i32 = arith.constant 0 : i32
    %c0_i32_0 = arith.constant 0 : i32
    return %arg0, %c0_i32 : i32, i32
  }
  func.func @transform_1(%arg0: i32) -> (i32, i32) {
    %c0_i32 = arith.constant 0 : i32
    %c0_i32_0 = arith.constant 0 : i32
    return %arg0, %c0_i32 : i32, i32
  }
  func.func @transform_2(%arg0: i32) -> (i32, i32) {
    %c0_i32 = arith.constant 0 : i32
    %c0_i32_0 = arith.constant 0 : i32
    %c0_i32_1 = arith.constant 0 : i32
    return %c0_i32, %c0_i32_0 : i32, i32
  }
  func.func @transform_3(%arg0: i32) -> (i32, i32) {
    %c0_i32 = arith.constant 0 : i32
    %c0_i32_0 = arith.constant 0 : i32
    %c0_i32_1 = arith.constant 0 : i32
    return %c0_i32, %c0_i32_0 : i32, i32
  }
  func.func @transform_4(%arg0: i32) -> (i32, i32) {
    %c0_i32 = arith.constant 0 : i32
    %c0_i32_0 = arith.constant 0 : i32
    %c0_i32_1 = arith.constant 0 : i32
    return %c0_i32, %c0_i32_0 : i32, i32
  }
  func.func @transform_5(%arg0: i32) -> (i32, i32) {
    %c0_i32 = arith.constant 0 : i32
    %c0_i32_0 = arith.constant 0 : i32
    %c0_i32_1 = arith.constant 0 : i32
    return %c0_i32, %c0_i32_0 : i32, i32
  }
  func.func @transform_6(%arg0: i32) -> (i32, i32) {
    %c0_i32 = arith.constant 0 : i32
    %c0_i32_0 = arith.constant 0 : i32
    %c0_i32_1 = arith.constant 0 : i32
    return %c0_i32, %c0_i32_0 : i32, i32
  }
  func.func @transform_7(%arg0: i32) -> (i32, i32) {
    %c0_i32 = arith.constant 0 : i32
    %c0_i32_0 = arith.constant 0 : i32
    return %arg0, %c0_i32 : i32, i32
  }
}

</mosaic_0001>

<bundles_post_ra>
// kernel: _generator_forward_impl.2
= control target key start
LH: loop header
LB: loop body
LE: loop exit
PB: predicated region body
PF: predicated region fallthrough
CT: control target
= control target key end

     0   :  { %12 = vsyncpa [#allocation3], 0  ;;  %s1320_s0 = inlined_call_operand.vmem [shape: bf16[16,128], index: 0, kind: input, shape index: {}]   ;;  %s1321_s1 = inlined_call_operand.vmem [shape: f32[16,1], index: 1, kind: input, shape index: {}]   ;;  %s1322_s2 = inlined_call_operand.hbm [shape: bf16[128,256], index: 2, kind: input, shape index: {}]   ;;  %s1323_s3 = inlined_call_operand.hbm [shape: f32[1,256], index: 3, kind: input, shape index: {}]   ;;  %s1324_s4 = inlined_call_operand.hbm [shape: f32[1,256], index: 4, kind: input, shape index: {}]   ;;  %s1325_s5 = inlined_call_operand.hbm [shape: bf16[256,512], index: 5, kind: input, shape index: {}]   ;;  %s1326_s6 = inlined_call_operand.hbm [shape: f32[1,512], index: 6, kind: input, shape index: {}]   ;;  %s1327_s7 = inlined_call_operand.vmem [shape: bf16[16,512], index: 7, kind: output, shape index: {}]  }
   0x1   :  { %13 = vsyncpa [#allocation5], 0 }
   0x2   :  { %14 = vsyncpa [#allocation8], 0  ;;  %s1182_s24 = smov [#allocation4]   ;;  %s1183_s26 = smov [#allocation7]  }
   0x3   :  { %s37_s25 = sshll.u32 %s1182_s24, 4  ;;  %s56_s27 = sshll.u32 %s1183_s26, 4  ;;  %s38_s25 = int_to_ptr.vmem [resolvable:$true] %s37_s25  ;;  %s1232_s27 = int_to_ptr.vmem [resolvable:$true] %s56_s27 }
   0x4   :  { %s1066_s30 = scalar_lea.hbm %s1323_s3, 32 }
   0x5   :  { %p1067_p0 = scmp.ne.s32.totalorder %s1323_s3, %s1066_s30  ;;  %p1070_p1 = scmp.lt.u32.totalorder %s1066_s30, %s1323_s3 }
   0x7   :  { %p1072_p2 = pnand %p1070_p1, %p1067_p0 }
   0x9   :  { %1075 = shalt.err (!%p1072_p2)
}
   0xa   :  { %s1076_s12 = scalar_lea.vmem %s38_s25, 32  ;;  %p1081_p4 = scmp.lt.s32.totalorder %s38_s25, %s38_s25 }
   0xb   :  { %p1077_p3 = scmp.ne.s32.totalorder %s38_s25, %s1076_s12  ;;  %p1082_p5 = scmp.lt.s32.totalorder %s1076_s12, %s1076_s12 }
   0xd   :  { %p1083_p6 = por %p1082_p5, %p1081_p4 }
   0xf   :  { %p1084_p7 = pnand %p1083_p6, %p1077_p3 }
  0x11   :  { %1087 = shalt.err (!%p1084_p7)
}
  0x12   :  { %40 = dma.hbm_to_vmem [thread:$0]  %s1323_s3, 32, %s38_s25, [#allocation5]  }
  0x13   :  { %s1088_s17 = scalar_lea.hbm %s1325_s5, 8192 }
  0x14   :  { %p1089_p8 = scmp.ne.s32.totalorder %s1325_s5, %s1088_s17  ;;  %p1092_p9 = scmp.lt.u32.totalorder %s1088_s17, %s1325_s5 }
  0x16   :  { %p1094_p10 = pnand %p1092_p9, %p1089_p8 }
  0x18   :  { %1097 = shalt.err (!%p1094_p10)
}
  0x19   :  { %s1098_s22 = scalar_lea.vmem %s1232_s27, 8192  ;;  %p1103_p12 = scmp.lt.s32.totalorder %s1232_s27, %s1232_s27 }
  0x1a   :  { %p1099_p11 = scmp.ne.s32.totalorder %s1232_s27, %s1098_s22  ;;  %p1104_p13 = scmp.lt.s32.totalorder %s1098_s22, %s1098_s22 }
  0x1c   :  { %p1105_p0 = por %p1104_p13, %p1103_p12 }
  0x1e   :  { %p1106_p1 = pnand %p1105_p0, %p1099_p11 }
  0x20   :  { %1109 = shalt.err (!%p1106_p1)
}
  0x21   :  { %s1184_s3 = smov 256   ;;  %s1185_s23 = smov 16  }
  0x22   :  { %62 = dma.hbm_to_vmem [thread:$0]  %s1325_s5, 8192, %s1232_s27, [#allocation8], %s1184_s3, %s1184_s3, %s1185_s23  }
  0x23   :  { %s1186_s26 = smov [#allocation2]   ;;  %s1110_s8 = scalar_lea.hbm %s1322_s2, 2048 }
  0x24   :  { %s24_s28 = sshll.u32 %s1186_s26, 4  ;;  %p1111_p2 = scmp.ne.s32.totalorder %s1322_s2, %s1110_s8  ;;  %s25_s28 = int_to_ptr.vmem [resolvable:$true] %s24_s28 }
  0x25   :  { %p1114_p3 = scmp.lt.u32.totalorder %s1110_s8, %s1322_s2 }
  0x27   :  { %p1116_p4 = pnand %p1114_p3, %p1111_p2 }
  0x29   :  { %1119 = shalt.err (!%p1116_p4)
}
  0x2a   :  { %s1120_s13 = scalar_lea.vmem %s25_s28, 2048  ;;  %p1125_p6 = scmp.lt.s32.totalorder %s25_s28, %s25_s28 }
  0x2b   :  { %p1121_p5 = scmp.ne.s32.totalorder %s25_s28, %s1120_s13  ;;  %p1126_p7 = scmp.lt.s32.totalorder %s1120_s13, %s1120_s13 }
  0x2d   :  { %p1127_p8 = por %p1126_p7, %p1125_p6 }
  0x2f   :  { %p1128_p9 = pnand %p1127_p8, %p1121_p5 }
  0x31   :  { %1131 = shalt.err (!%p1128_p9)
}
  0x32   :  { %s1187_s5 = smov 128   ;;  %s1188_s27 = smov 8  }
  0x33   :  { %30 = dma.hbm_to_vmem [thread:$0]  %s1322_s2, 2048, %s25_s28, [#allocation3], %s1187_s5, %s1187_s5, %s1188_s27  }
  0x34   :  { %s1189_s16 = smov [#allocation6]   ;;  %s1190_s18 = smov [#allocation9]  }
  0x35   :  { %s47_s17 = sshll.u32 %s1189_s16, 4  ;;  %s69_s19 = sshll.u32 %s1190_s18, 4  ;;  %s48_s17 = int_to_ptr.vmem [resolvable:$true] %s47_s17  ;;  %s70_s19 = int_to_ptr.vmem [resolvable:$true] %s69_s19 }
  0x36   :  { %s1132_s22 = scalar_lea.hbm %s1324_s4, 32 }
  0x37   :  { %p1133_p10 = scmp.ne.s32.totalorder %s1324_s4, %s1132_s22  ;;  %p1136_p11 = scmp.lt.u32.totalorder %s1132_s22, %s1324_s4 }
  0x39   :  { %p1138_p12 = pnand %p1136_p11, %p1133_p10 }
  0x3b   :  { %1141 = shalt.err (!%p1138_p12)
}
  0x3c   :  { %s1142_s2 = scalar_lea.vmem %s48_s17, 32  ;;  %p1147_p0 = scmp.lt.s32.totalorder %s48_s17, %s48_s17 }
  0x3d   :  { %p1143_p13 = scmp.ne.s32.totalorder %s48_s17, %s1142_s2  ;;  %p1148_p1 = scmp.lt.s32.totalorder %s1142_s2, %s1142_s2 }
  0x3f   :  { %p1149_p2 = por %p1148_p1, %p1147_p0 }
  0x41   :  { %p1150_p3 = pnand %p1149_p2, %p1143_p13 }
  0x43   :  { %1153 = shalt.err (!%p1150_p3)
}
  0x44   :  { %50 = dma.hbm_to_vmem [thread:$0]  %s1324_s4, 32, %s48_s17, [#allocation5]  }
  0x45   :  { %s1154_s8 = scalar_lea.hbm %s1326_s6, 64 }
  0x46   :  { %p1155_p4 = scmp.ne.s32.totalorder %s1326_s6, %s1154_s8  ;;  %p1158_p5 = scmp.lt.u32.totalorder %s1154_s8, %s1326_s6 }
  0x48   :  { %p1160_p6 = pnand %p1158_p5, %p1155_p4 }
  0x4a   :  { %1163 = shalt.err (!%p1160_p6)
}
  0x4b   :  { %s1164_s13 = scalar_lea.vmem %s70_s19, 64  ;;  %p1169_p8 = scmp.lt.s32.totalorder %s70_s19, %s70_s19 }
  0x4c   :  { %p1165_p7 = scmp.ne.s32.totalorder %s70_s19, %s1164_s13  ;;  %p1170_p9 = scmp.lt.s32.totalorder %s1164_s13, %s1164_s13 }
  0x4e   :  { %p1171_p10 = por %p1170_p9, %p1169_p8 }
  0x50   :  { %p1172_p11 = pnand %p1171_p10, %p1165_p7 }
  0x52   :  { %1175 = shalt.err (!%p1172_p11)
}
  0x53   :  { %72 = dma.hbm_to_vmem [thread:$0]  %s1326_s6, 64, %s70_s19, [#allocation8]  }
  0x54   :  { %1176 = dma.done.wait [#allocation3], 2048  }
  0x55   :  { %1177 = vsyncadd [#allocation3], 4294965248 }
  0x56   :  { %1178 = dma.done.wait [#allocation5], 64  }
  0x57   :  { %1179 = vsyncadd [#allocation5], 4294967232 }
  0x58   :  { %1180 = dma.done.wait [#allocation8], 8256  }
  0x59   :  { %1181 = vsyncadd [#allocation8], 4294959040  ;;  %v1191_v0 = vmov 0   ;;  %v945_v1 = vld [vmem:[#allocation2 + $0x4] ss:$8 sps:$4 sm:$0xff]  }
  0x5a   :  { %253 = vmatprep.mubr.bf16.mxu0 %v1191_v0  ;;  %944 = vset.pattern.permute.xlu0 %v1191_v0  ;;  %v947_v2 = vld [vmem:[#allocation2] ss:$8 sps:$4 sm:$0xff]   ;;  %v948_v3 = vld [vmem:[#allocation2 + $0x14] ss:$8 sps:$4 sm:$0xff]   ;;  %v950_v4 = vld [vmem:[#allocation2 + $0x10] ss:$8 sps:$4 sm:$0xff]  }
  0x5b   :  { %221 = vmatprep.subr.bf16.mxu0 %v945_v1  ;;  %v951_v5 = vld [vmem:[#allocation2 + $0x24] ss:$8 sps:$4 sm:$0xff]   ;;  %v953_v6 = vld [vmem:[#allocation2 + $0x20] ss:$8 sps:$4 sm:$0xff]   ;;  %v954_v7 = vld [vmem:[#allocation2 + $0x34] ss:$8 sps:$4 sm:$0xff]  }
  0x5c   :  { %222 = vmatpush1.bf16.msra.mxu0 %v947_v2  ;;  %v956_v8 = vld [vmem:[#allocation2 + $0x30] ss:$8 sps:$4 sm:$0xff]   ;;  %v957_v9 = vld [vmem:[#allocation2 + $0x44] ss:$8 sps:$4 sm:$0xff]   ;;  %v959_v13 = vld [vmem:[#allocation2 + $0x40] ss:$8 sps:$4 sm:$0xff]  }
  0x5d   :  { %223 = vmatprep.subr.bf16.mxu0 %v948_v3  ;;  %v107_v10 = vld [vmem:[%s1321_s1] sm:$0xff]  ;;  %v108_v11 = vld [vmem:[%s1321_s1 + $0x8] sm:$0xff]  ;;  %v960_v16 = vld [vmem:[#allocation2 + $0x54] ss:$8 sps:$4 sm:$0xff]  }
  0x5e   :  { %112 = vperm.xlu0 %944, %v107_v10   ;;  %v970_v12 = vld [vmem:[#allocation7 + $0x4] ss:$16 sps:$4 sm:$0xff]   ;;  %v975_v14 = vld [vmem:[#allocation7] ss:$16 sps:$4 sm:$0xff]   ;;  %v974_v28 = vld [vmem:[#allocation7 + $0xc] ss:$16 sps:$4 sm:$0xff]  }
  0x5f   :  { %700 = vmatprep.subr.bf16.mxu1 %v970_v12  ;;  %v976_v15 = vld [vmem:[#allocation7 + $0x24] ss:$16 sps:$4 sm:$0xff]   ;;  %v981_v17 = vld [vmem:[#allocation7 + $0x20] ss:$16 sps:$4 sm:$0xff]   ;;  %v972_v32 = vld [vmem:[#allocation7 + $0x8] ss:$16 sps:$4 sm:$0xff]  }
  0x60   :  { %224 = vmatpush1.bf16.msra.mxu0 %v950_v4  ;;  %701 = vmatpush1.bf16.msra.mxu1 %v975_v14  ;;  %v982_v18 = vld [vmem:[#allocation7 + $0x44] ss:$16 sps:$4 sm:$0xff]   ;;  %v963_v20 = vld [vmem:[#allocation2 + $0x64] ss:$8 sps:$4 sm:$0xff]   ;;  %v966_v24 = vld [vmem:[#allocation2 + $0x74] ss:$8 sps:$4 sm:$0xff]  }
  0x61   :  { %225 = vmatprep.subr.bf16.mxu0 %v951_v5  ;;  %702 = vmatprep.subr.bf16.mxu1 %v976_v15  ;;  %v962_v19 = vld [vmem:[#allocation2 + $0x50] ss:$8 sps:$4 sm:$0xff]   ;;  %v987_v21 = vld [vmem:[#allocation7 + $0x40] ss:$16 sps:$4 sm:$0xff]   ;;  %v965_v23 = vld [vmem:[#allocation2 + $0x60] ss:$8 sps:$4 sm:$0xff]  }
  0x62   :  { %117 = vperm.xlu0 %944, %v108_v11   ;;  %v988_v22 = vld [vmem:[#allocation7 + $0x64] ss:$16 sps:$4 sm:$0xff]   ;;  %v993_v25 = vld [vmem:[#allocation7 + $0x60] ss:$16 sps:$4 sm:$0xff]   ;;  %v980_v33 = vld [vmem:[#allocation7 + $0x2c] ss:$16 sps:$4 sm:$0xff]  }
  0x63   :  { %v994_v26 = vld [vmem:[#allocation7 + $0x84] ss:$16 sps:$4 sm:$0xff]   ;;  %v999_v29 = vld [vmem:[#allocation7 + $0x80] ss:$16 sps:$4 sm:$0xff]   ;;  %v978_v36 = vld [vmem:[#allocation7 + $0x28] ss:$16 sps:$4 sm:$0xff]  }
  0x64   :  { %226 = vmatpush1.bf16.msra.mxu0 %v953_v6  ;;  %703 = vmatpush1.bf16.msra.mxu1 %v981_v17  ;;  %v968_v27 = vld [vmem:[#allocation2 + $0x70] ss:$8 sps:$4 sm:$0xff]   ;;  %v969_v30 = vld [vmem:[%s1320_s0] sm:$0xff]   ;;  %v984_v40 = vld [vmem:[#allocation7 + $0x48] ss:$16 sps:$4 sm:$0xff]  }
  0x65   :  { %227 = vmatprep.subr.bf16.mxu0 %v954_v7  ;;  %704 = vmatprep.subr.bf16.mxu1 %v982_v18  ;;  %v1000_v31 = vld [vmem:[#allocation7 + $0xa4] ss:$16 sps:$4 sm:$0xff]   ;;  %v1005_v34 = vld [vmem:[#allocation7 + $0xa0] ss:$16 sps:$4 sm:$0xff]   ;;  %v986_v37 = vld [vmem:[#allocation7 + $0x4c] ss:$16 sps:$4 sm:$0xff]  }
  0x66   :  { %v1006_v35 = vld [vmem:[#allocation7 + $0xc4] ss:$16 sps:$4 sm:$0xff]   ;;  %v1011_v38 = vld [vmem:[#allocation7 + $0xc0] ss:$16 sps:$4 sm:$0xff]   ;;  %v992_v41 = vld [vmem:[#allocation7 + $0x6c] ss:$16 sps:$4 sm:$0xff]  }
  0x67   :  { %v1012_v39 = vld [vmem:[#allocation7 + $0xe4] ss:$16 sps:$4 sm:$0xff]   ;;  %v1017_v42 = vld [vmem:[#allocation7 + $0xe0] ss:$16 sps:$4 sm:$0xff]   ;;  %v990_v44 = vld [vmem:[#allocation7 + $0x68] ss:$16 sps:$4 sm:$0xff]  }
  0x68   :  { %228 = vmatpush1.bf16.msra.mxu0 %v956_v8  ;;  %705 = vmatpush1.bf16.msra.mxu1 %v987_v21  ;;  %v1018_v43 = vld [vmem:[#allocation7 + $0x104] ss:$16 sps:$4 sm:$0xff]   ;;  %v998_v45 = vld [vmem:[#allocation7 + $0x8c] ss:$16 sps:$4 sm:$0xff]   ;;  %v996_v46 = vld [vmem:[#allocation7 + $0x88] ss:$16 sps:$4 sm:$0xff]  }
  0x69   :  { %229 = vmatprep.subr.bf16.mxu0 %v957_v9  ;;  %706 = vmatprep.subr.bf16.mxu1 %v988_v22  ;;  %v1023_v47 = vld [vmem:[#allocation7 + $0x100] ss:$16 sps:$4 sm:$0xff]   ;;  %v1004_v48 = vld [vmem:[#allocation7 + $0xac] ss:$16 sps:$4 sm:$0xff]   ;;  %v1024_v49 = vld [vmem:[#allocation7 + $0x124] ss:$16 sps:$4 sm:$0xff]  }
  0x6a   :  { %v1029_v50 = vld [vmem:[#allocation7 + $0x120] ss:$16 sps:$4 sm:$0xff]   ;;  %v1030_v51 = vld [vmem:[#allocation7 + $0x144] ss:$16 sps:$4 sm:$0xff]   ;;  %v1002_v52 = vld [vmem:[#allocation7 + $0xa8] ss:$16 sps:$4 sm:$0xff]  }
  0x6b   :  { %v1010_v53 = vld [vmem:[#allocation7 + $0xcc] ss:$16 sps:$4 sm:$0xff]   ;;  %v1035_v54 = vld [vmem:[#allocation7 + $0x140] ss:$16 sps:$4 sm:$0xff]   ;;  %v1036_v55 = vld [vmem:[#allocation7 + $0x164] ss:$16 sps:$4 sm:$0xff]  }
  0x6c   :  { %230 = vmatpush1.bf16.msra.mxu0 %v959_v13  ;;  %707 = vmatpush1.bf16.msra.mxu1 %v993_v25  ;;  %v1008_v56 = vld [vmem:[#allocation7 + $0xc8] ss:$16 sps:$4 sm:$0xff]   ;;  %v1016_v57 = vld [vmem:[#allocation7 + $0xec] ss:$16 sps:$4 sm:$0xff]   ;;  %v1041_v58 = vld [vmem:[#allocation7 + $0x160] ss:$16 sps:$4 sm:$0xff]  }
  0x6d   :  { %231 = vmatprep.subr.bf16.mxu0 %v960_v16  ;;  %708 = vmatprep.subr.bf16.mxu1 %v994_v26  ;;  %v1042_v59 = vld [vmem:[#allocation7 + $0x184] ss:$16 sps:$4 sm:$0xff]   ;;  %v1014_v60 = vld [vmem:[#allocation7 + $0xe8] ss:$16 sps:$4 sm:$0xff]   ;;  %v1022_v61 = vld [vmem:[#allocation7 + $0x10c] ss:$16 sps:$4 sm:$0xff]  }
  0x6e   :  { %v1047_v62 = vld [vmem:[#allocation7 + $0x180] ss:$16 sps:$4 sm:$0xff]   ;;  %v1020_v63 = vld [vmem:[#allocation7 + $0x108] ss:$16 sps:$4 sm:$0xff]   ;;  %v1028_v0 = vld [vmem:[#allocation7 + $0x12c] ss:$16 sps:$4 sm:$0xff]  }
  0x6f   :  { %v1026_v1 = vld [vmem:[#allocation7 + $0x128] ss:$16 sps:$4 sm:$0xff]   ;;  %v1034_v2 = vld [vmem:[#allocation7 + $0x14c] ss:$16 sps:$4 sm:$0xff]   ;;  %v1048_v8 = vld [vmem:[#allocation7 + $0x1a4] ss:$16 sps:$4 sm:$0xff]  }
  0x70   :  { %232 = vmatpush1.bf16.msra.mxu0 %v962_v19  ;;  %709 = vmatpush1.bf16.msra.mxu1 %v999_v29  ;;  %v1032_v3 = vld [vmem:[#allocation7 + $0x148] ss:$16 sps:$4 sm:$0xff]   ;;  %v1040_v4 = vld [vmem:[#allocation7 + $0x16c] ss:$16 sps:$4 sm:$0xff]   ;;  %v1053_v11 = vld [vmem:[#allocation7 + $0x1a0] ss:$16 sps:$4 sm:$0xff]  }
  0x71   :  { %233 = vmatprep.subr.bf16.mxu0 %v963_v20  ;;  %710 = vmatprep.subr.bf16.mxu1 %v1000_v31  ;;  %v1038_v5 = vld [vmem:[#allocation7 + $0x168] ss:$16 sps:$4 sm:$0xff]   ;;  %v1046_v6 = vld [vmem:[#allocation7 + $0x18c] ss:$16 sps:$4 sm:$0xff]   ;;  %v1054_v12 = vld [vmem:[#allocation7 + $0x1c4] ss:$16 sps:$4 sm:$0xff]   ;;  %v121_v20 = vlaneseq }
  0x72   :  { %v1044_v7 = vld [vmem:[#allocation7 + $0x188] ss:$16 sps:$4 sm:$0xff]   ;;  %v1052_v9 = vld [vmem:[#allocation7 + $0x1ac] ss:$16 sps:$4 sm:$0xff]   ;;  %v1059_v15 = vld [vmem:[#allocation7 + $0x1c0] ss:$16 sps:$4 sm:$0xff]  }
  0x73   :  { %v1050_v10 = vld [vmem:[#allocation7 + $0x1a8] ss:$16 sps:$4 sm:$0xff]   ;;  %v1058_v13 = vld [vmem:[#allocation7 + $0x1cc] ss:$16 sps:$4 sm:$0xff]   ;;  %v1060_v16 = vld [vmem:[#allocation7 + $0x1e4] ss:$16 sps:$4 sm:$0xff]  }
  0x74   :  { %234 = vmatpush1.bf16.msra.mxu0 %v965_v23  ;;  %711 = vmatpush1.bf16.msra.mxu1 %v1005_v34  ;;  %v1056_v14 = vld [vmem:[#allocation7 + $0x1c8] ss:$16 sps:$4 sm:$0xff]   ;;  %v1064_v18 = vld [vmem:[#allocation7 + $0x1ec] ss:$16 sps:$4 sm:$0xff]   ;;  %v1065_v19 = vld [vmem:[#allocation7 + $0x1e0] ss:$16 sps:$4 sm:$0xff]  }
  0x75   :  { %235 = vmatprep.subr.bf16.mxu0 %v966_v24  ;;  %712 = vmatprep.subr.bf16.mxu1 %v1006_v35  ;;  %v1062_v17 = vld [vmem:[#allocation7 + $0x1e8] ss:$16 sps:$4 sm:$0xff]   ;;  %v122_v21 = vshrl.u32 %v121_v20, 7  ;;  %v109_v23 = vld [vmem:[#allocation4] sm:$0x3] }
  0x77   :  { %v123_v22 = vsub.s32 0, %v122_v21  ;;  %v127_v24 = vsub.s32 1, %v122_v21 }
  0x78   :  { %236 = vmatpush1.bf16.msra.mxu0 %v968_v27  ;;  %713 = vmatpush1.bf16.msra.mxu1 %v1011_v38 }
  0x79   :  { %743 = vmatprep.subr.bf16.mxu0 %v974_v28  ;;  %714 = vmatprep.subr.bf16.mxu1 %v1012_v39  ;;  %v124_v26 = vrot.slane %v109_v23, %v123_v22  ;;  %v128_v27 = vrot.slane %v109_v23, %v127_v24  ;;  %v264_v28 = vld [vmem:[#allocation6] sm:$0x3] }
  0x7a   :  { %v269_v31 = vrot.slane %v264_v28, %v123_v22  ;;  %v273_v34 = vrot.slane %v264_v28, %v127_v24 }
  0x7b   :  { %254 = vmatmul.mubr.bf16.vlgmr.msra.gmra.mrb[0].mxu0 %v969_v30 }
  0x7c   :  { %744 = vmatpush1.bf16.msra.mxu0 %v972_v32  ;;  %715 = vmatpush1.bf16.msra.mxu1 %v1017_v42 }
  0x7d   :  { %745 = vmatprep.subr.bf16.mxu0 %v980_v33  ;;  %716 = vmatprep.subr.bf16.mxu1 %v1018_v43 }
  0x80   :  { %746 = vmatpush1.bf16.msra.mxu0 %v978_v36  ;;  %717 = vmatpush1.bf16.msra.mxu1 %v1023_v47 }
  0x81   :  { %747 = vmatprep.subr.bf16.mxu0 %v986_v37  ;;  %718 = vmatprep.subr.bf16.mxu1 %v1024_v49 }
  0x84   :  { %748 = vmatpush1.bf16.msra.mxu0 %v984_v40  ;;  %719 = vmatpush1.bf16.msra.mxu1 %v1029_v50 }
  0x85   :  { %749 = vmatprep.subr.bf16.mxu0 %v992_v41  ;;  %720 = vmatprep.subr.bf16.mxu1 %v1030_v51 }
  0x88   :  { %750 = vmatpush1.bf16.msra.mxu0 %v990_v44  ;;  %721 = vmatpush1.bf16.msra.mxu1 %v1035_v54 }
  0x89   :  { %751 = vmatprep.subr.bf16.mxu0 %v998_v45  ;;  %722 = vmatprep.subr.bf16.mxu1 %v1036_v55 }
  0x8c   :  { %752 = vmatpush1.bf16.msra.mxu0 %v996_v46  ;;  %723 = vmatpush1.bf16.msra.mxu1 %v1041_v58  ;;  %v370_v58 = vsub.s32 2, %v122_v21 }
  0x8d   :  { %753 = vmatprep.subr.bf16.mxu0 %v1004_v48  ;;  %724 = vmatprep.subr.bf16.mxu1 %v1042_v59  ;;  %v358_v59 = vld [vmem:[#allocation9] sm:$0xf] }
  0x90   :  { %754 = vmatpush1.bf16.msra.mxu0 %v1002_v52  ;;  %725 = vmatpush1.bf16.msra.mxu1 %v1047_v62  ;;  %v371_v62 = vrot.slane %v358_v59, %v370_v58 }
  0x91   :  { %755 = vmatprep.subr.bf16.mxu0 %v1010_v53  ;;  %726 = vmatprep.subr.bf16.mxu1 %v1048_v8 }
  0x94   :  { %756 = vmatpush1.bf16.msra.mxu0 %v1008_v56  ;;  %727 = vmatpush1.bf16.msra.mxu1 %v1053_v11 }
  0x95   :  { %757 = vmatprep.subr.bf16.mxu0 %v1016_v57  ;;  %728 = vmatprep.subr.bf16.mxu1 %v1054_v12 }
  0x98   :  { %758 = vmatpush1.bf16.msra.mxu0 %v1014_v60  ;;  %729 = vmatpush1.bf16.msra.mxu1 %v1059_v15  ;;  %v374_v60 = vsub.s32 3, %v122_v21 }
  0x99   :  { %759 = vmatprep.subr.bf16.mxu0 %v1022_v61  ;;  %730 = vmatprep.subr.bf16.mxu1 %v1060_v16  ;;  %v363_v61 = vrot.slane %v358_v59, %v123_v22 }
  0x9c   :  { %760 = vmatpush1.bf16.msra.mxu0 %v1020_v63  ;;  %731 = vmatpush1.bf16.msra.mxu1 %v1065_v19  ;;  %v367_v63 = vrot.slane %v358_v59, %v127_v24 }
  0x9d   :  { %761 = vmatprep.subr.bf16.mxu0 %v1028_v0  ;;  %v375_v0 = vrot.slane %v358_v59, %v374_v60 }
  0xa0   :  { %762 = vmatpush1.bf16.msra.mxu0 %v1026_v1 }
  0xa1   :  { %763 = vmatprep.subr.bf16.mxu0 %v1034_v2 }
  0xa4   :  { %764 = vmatpush1.bf16.msra.mxu0 %v1032_v3 }
  0xa5   :  { %765 = vmatprep.subr.bf16.mxu0 %v1040_v4 }
  0xa8   :  { %766 = vmatpush1.bf16.msra.mxu0 %v1038_v5 }
  0xa9   :  { %767 = vmatprep.subr.bf16.mxu0 %v1046_v6 }
  0xac   :  { %768 = vmatpush1.bf16.msra.mxu0 %v1044_v7 }
  0xad   :  { %769 = vmatprep.subr.bf16.mxu0 %v1052_v9 }
  0xb0   :  { %770 = vmatpush1.bf16.msra.mxu0 %v1050_v10 }
  0xb1   :  { %771 = vmatprep.subr.bf16.mxu0 %v1058_v13 }
  0xb4   :  { %772 = vmatpush1.bf16.msra.mxu0 %v1056_v14 }
  0xb5   :  { %773 = vmatprep.subr.bf16.mxu0 %v1064_v18 }
  0xb8   :  { %774 = vmatpush1.bf16.msra.mxu0 %v1062_v17 }
  0xdd   :  { %v113_v25 = vpop.permute.xlu0 %112 }
  0xde   :  { %v131_v29 = vmul.f32 %v124_v26, %v113_v25  ;;  %v132_v32 = vmul.f32 %v128_v27, %v113_v25 }
  0xe1   :  { %v118_v30 = vpop.permute.xlu0 %117 }
  0xe2   :  { %v133_v35 = vmul.f32 %v124_v26, %v118_v30  ;;  %v134_v38 = vmul.f32 %v128_v27, %v118_v30 }
 0x14e   :  { %v255_v33 = vpop.f32.mrb[0].mxu0 }
 0x14f   :  { %v256_v36 = vadd.f32 %v255_v33, %v131_v29  ;;  %v257_v37 = vpop.f32.mrb[1].mxu0 }
 0x150   :  { %v258_v39 = vadd.f32 %v257_v37, %v132_v32  ;;  %v259_v40 = vpop.f32.mrb[2].mxu0 }
 0x151   :  { %v276_v41 = vadd.f32 %v269_v31, %v256_v36  ;;  %v260_v42 = vadd.f32 %v259_v40, %v133_v35  ;;  %v261_v43 = vpop.f32.mrb[3].mxu0 }
 0x152   :  { %v277_v44 = vadd.f32 %v273_v34, %v258_v39  ;;  %v262_v45 = vadd.f32 %v261_v43, %v134_v38 }
 0x153   :  { %v284_v46 = vmul.f32 0.01, %v276_v41  ;;  %v278_v47 = vadd.f32 %v269_v31, %v260_v42  ;;  %vm280_vm0 = vcmp.gt.f32.partialorder %v276_v41, 0.0 }
 0x154   :  { %v279_v48 = vadd.f32 %v273_v34, %v262_v45  ;;  %v285_v49 = vmul.f32 0.01, %v277_v44  ;;  %vm281_vm2 = vcmp.gt.f32.partialorder %v277_v44, 0.0 }
 0x155   :  { %vm282_vm1 = vcmp.gt.f32.partialorder %v278_v47, 0.0  ;;  %v286_v50 = vmul.f32 0.01, %v278_v47  ;;  %v288_v52 = vsel %vm280_vm0, %v276_v41, %v284_v46 }
 0x156   :  { %vm283_vm3 = vcmp.gt.f32.partialorder %v279_v48, 0.0  ;;  %v287_v51 = vmul.f32 0.01, %v279_v48  ;;  %v289_v54 = vsel %vm281_vm2, %v277_v44, %v285_v49 }
 0x157   :  { %v290_v53 = vsel %vm282_vm1, %v278_v47, %v286_v50 }
 0x158   :  { %v291_v55 = vsel %vm283_vm3, %v279_v48, %v287_v51  ;;  %v292_v56 = vpack.c.bf16 %v290_v53, %v288_v52 }
 0x159   :  { %v293_v57 = vpack.c.bf16 %v291_v55, %v289_v54 }
 0x15b   :  { %732 = vmatprep.mubr.bf16.mxu1 %v293_v57  ;;  %775 = vmatprep.mubr.bf16.mxu0 %v293_v57 }
 0x15c   :  { %733 = vmatmul.mubr.bf16.vlgmr.msra.gmra.mrb[0].mxu1 %v292_v56  ;;  %776 = vmatmul.mubr.bf16.vlgmr.msra.gmra.mrb[4].mxu0 %v292_v56 }
 0x22f   :  { %v734_v1 = vpop.f32.mrb[0].mxu1  ;;  %v777_v2 = vpop.f32.mrb[4].mxu0 }
 0x230   :  { %v735_v3 = vadd.f32 %v734_v1, %v363_v61  ;;  %v778_v4 = vadd.f32 %v777_v2, %v371_v62  ;;  %v736_v5 = vpop.f32.mrb[1].mxu1  ;;  %v779_v6 = vpop.f32.mrb[5].mxu0 }
 0x231   :  { %v737_v7 = vadd.f32 %v736_v5, %v367_v63  ;;  %v780_v8 = vadd.f32 %v779_v6, %v375_v0  ;;  %v738_v9 = vpop.f32.mrb[2].mxu1  ;;  %v781_v10 = vpop.f32.mrb[6].mxu0 }
 0x232   :  { %vm786_vm4 = vcmp.gt.f32.partialorder %v735_v3, 0.0  ;;  %v794_v11 = vmul.f32 0.01, %v735_v3  ;;  %vm788_vm5 = vcmp.gt.f32.partialorder %v778_v4, 0.0  ;;  %v796_v12 = vmul.f32 0.01, %v778_v4 }
 0x233   :  { %vm787_vm6 = vcmp.gt.f32.partialorder %v737_v7, 0.0  ;;  %v795_v13 = vmul.f32 0.01, %v737_v7  ;;  %vm789_vm7 = vcmp.gt.f32.partialorder %v780_v8, 0.0  ;;  %v797_v14 = vmul.f32 0.01, %v780_v8 }
 0x234   :  { %v802_v15 = vsel %vm786_vm4, %v735_v3, %v794_v11  ;;  %v804_v16 = vsel %vm788_vm5, %v778_v4, %v796_v12  ;;  %v739_v17 = vadd.f32 %v738_v9, %v363_v61  ;;  %v782_v18 = vadd.f32 %v781_v10, %v371_v62  ;;  %v740_v19 = vpop.f32.mrb[3].mxu1  ;;  %v783_v20 = vpop.f32.mrb[7].mxu0 }
 0x235   :  { %v803_v21 = vsel %vm787_vm6, %v737_v7, %v795_v13  ;;  %v805_v22 = vsel %vm789_vm7, %v780_v8, %v797_v14  ;;  %v741_v23 = vadd.f32 %v740_v19, %v367_v63  ;;  %v784_v24 = vadd.f32 %v783_v20, %v375_v0 }
 0x236   :  { %v930_v25 = vpack.c.bf16 %v803_v21, %v802_v15  ;;  %v931_v26 = vpack.c.bf16 %v805_v22, %v804_v16  ;;  %vm790_vm8 = vcmp.gt.f32.partialorder %v739_v17, 0.0  ;;  %v798_v27 = vmul.f32 0.01, %v739_v17 }
 0x237   :  { %vm792_vm9 = vcmp.gt.f32.partialorder %v782_v18, 0.0  ;;  %v800_v28 = vmul.f32 0.01, %v782_v18  ;;  %vm791_vm10 = vcmp.gt.f32.partialorder %v741_v23, 0.0  ;;  %v799_v29 = vmul.f32 0.01, %v741_v23 }
 0x238   :  { %834 = vst [vmem:[%s1327_s7] sm:$0xff] %v930_v25  ;;  %835 = vst [vmem:[%s1327_s7 + $0x8] sm:$0xff] %v931_v26  ;;  %v806_v30 = vsel %vm790_vm8, %v739_v17, %v798_v27  ;;  %vm793_vm11 = vcmp.gt.f32.partialorder %v784_v24, 0.0  ;;  %v801_v31 = vmul.f32 0.01, %v784_v24 }
 0x239   :  { %v808_v32 = vsel %vm792_vm9, %v782_v18, %v800_v28  ;;  %v807_v33 = vsel %vm791_vm10, %v741_v23, %v799_v29 }
 0x23a   :  { %v932_v34 = vpack.c.bf16 %v807_v33, %v806_v30  ;;  %v809_v35 = vsel %vm793_vm11, %v784_v24, %v801_v31 }
 0x23b   :  { %v933_v36 = vpack.c.bf16 %v809_v35, %v808_v32 }
 0x23c   :  { %836 = vst [vmem:[%s1327_s7 + $0x10] sm:$0xff] %v932_v34 }
 0x23d   :  { %837 = vst [vmem:[%s1327_s7 + $0x18] sm:$0xff] %v933_v36 }
 0x23e   :  { %842 = vsyncpa [#allocation3], 1 }
 0x23f   :  { %843 = vsyncpa [#allocation5], 1 }
 0x240   :  { %844 = vsyncpa [#allocation8], 1 }

// kernel: _generator_forward_impl.3
= control target key start
LH: loop header
LB: loop body
LE: loop exit
PB: predicated region body
PF: predicated region fallthrough
CT: control target
= control target key end

     0   :  { %8 = vsyncpa [#allocation3], 0  ;;  %s2405_s0 = inlined_call_operand.vmem [shape: bf16[16,512], index: 0, kind: input, shape index: {}]   ;;  %s2406_s1 = inlined_call_operand.hbm [shape: bf16[512,1536], index: 1, kind: input, shape index: {}]   ;;  %s2407_s2 = inlined_call_operand.hbm [shape: f32[1,1536], index: 2, kind: input, shape index: {}]   ;;  %s2408_s3 = inlined_call_operand.hbm [shape: f32[16,1536], index: 3, kind: output, shape index: {}]  }
   0x1   :  { %10 = vsyncpa [#allocation3 + $0x1], 0 }
   0x2   :  { %11 = vsyncpa [#allocation6], 0 }
   0x3   :  { %13 = vsyncpa [#allocation6 + $0x1], 0 }
   0x4   :  { %14 = vsyncpa [#allocation4], 0 }
   0x5   :  { %16 = vsyncpa [#allocation4 + $0x1], 0  ;;  %s2046_s12 = smov 0   ;;  %s2048_s13 = smov 0  }
   0x6   :  { %s2050_s14 = smov 0   ;;  %s2052_s15 = smov 0  }
   0x7   :  { %s2054_s16 = smov 0   ;;  %s2056_s17 = smov 0  }
   0x8 LB: > { %s1411_s18 = sadd.s32 4294967295, %s2015_s17   ;;  %s1412_s19 = sadd.s32 4294967294, %s2015_s17   ;;  %s2015_s17 = sphi %s2056_s17, %s22_s17   ;;  %s2011_s16 = sphi %s2054_s16, %s2425_s16   ;;  %s2007_s15 = sphi %s2052_s15, %s2424_s15   ;;  %s2003_s14 = sphi %s2050_s14, %s2423_s14   ;;  %s1999_s13 = sphi %s2048_s13, %s2422_s13   ;;  %s1995_s12 = sphi %s2046_s12, %s2421_s12  }
   0x9   : > { %s34_s20 = sadd.s32 1, %s2011_s16  ;;  %s67_s21 = sadd.s32 1, %s2003_s14 }
   0xa   : > { %p36_p0 = scmp.ge.s32.totalorder %s34_s20, 3  ;;  %p74_p1 = scmp.ne.s32.totalorder %s2003_s14, %s1999_s13 }
   0xb   : > { %p75_p2 = scmp.eq.s32.totalorder %s2015_s17, 0  ;;  %p80_p3 = scmp.ne.s32.totalorder %s1999_s13, %s1995_s12 }
   0xc   : > { %s2427_s20 = smov (%p36_p0, %s34_s20), 0  ;;  %p81_p5 = scmp.eq.s32.totalorder %s1411_s18, 0 }
   0xd   : > { %p2087_p4 = por %p75_p2, %p74_p1  ;;  %s64_s23 = ssub.s32 %s2011_s16, %s2427_s20 }
   0xe   : > { %p132_p6 = scmp.eq.s32.totalorder %s1411_s18, 2  ;;  %p65_p7 = scmp.eq.s32.totalorder %s64_s23, 0 }
   0xf   : > { %p2093_p8 = por %p81_p5, %p80_p3  ;;  %p138_p10 = scmp.eq.s32.totalorder %s1412_s19, 2 }
  0x10   : > { %p2097_p9 = por %p132_p6, %p74_p1  ;;  %p1599_p12 = scmp.lt.s32.totalorder %s2015_s17, 3 }
  0x11   : > { %s2412_s24 = scalar_select %p2093_p8, 1, 0 }
  0x12   : > { %s2413_s25 = scalar_select %p2097_p9, 1, 0 }
  0x13   : > { %s2102_s26 = scalar_select %p65_p7, %s2003_s14, %s67_s21  }
  0x14   : > { %p2104_p11 = por %p138_p10, %p80_p3  ;;  %s2110_s28 = sand.u32 1, %s2003_s14  }
  0x15   : > { %s1416_s29 = sshll.u32 %s2110_s28, 10  ;;  %s1563_s30 = sshll.u32 %s2011_s16, 8 }
  0x16   : > { %s2414_s27 = scalar_select %p2104_p11, 1, 0 }
  0x17   : > { %s2117_s6 = scalar_lea.hbm %s2406_s1, %s1563_s30  ;;  %s172_s7 = scalar_lea.vmem [#allocation2], %s1416_s29 }
  0x18   : > { %s179_s8 = sshll.u32 %s172_s7, 4  ;;  %p2123_p13 = pnand %p1599_p12, %p2087_p4  ;;  %s2119_s8 = int_to_ptr.vmem [resolvable:$true] %s179_s8 }
  0x19   : > { %s169_s10 = scalar_lea.sflag [#allocation3], %s2110_s28  ;;  %s1869_s11 = scalar_lea.hbm %s2117_s6, 16384 }
  0x1a   : > { %p1870_p0 = scmp.ne.s32.totalorder %s2117_s6, %s1869_s11  ;;  %p1871_p1 = pneg %p2123_p13 }
  0x1b   : > { %s1874_s21 = scalar_lea.hbm %s2406_s1, 49152  ;;  %p1875_p4 = scmp.lt.u32.totalorder %s2117_s6, %s2406_s1 }
  0x1c   : > { %p1872_p2 = pnand %p1871_p1, %p1870_p0  ;;  %p1876_p5 = scmp.lt.u32.totalorder %s1874_s21, %s1869_s11 }
  0x1d   : > { %p1878_p7 = scmp.lt.u32.totalorder %s1869_s11, %s2117_s6 }
  0x1e   : > { %p1873_p3 = pneg %p1872_p2  ;;  %p1877_p6 = por %p1876_p5, %p1875_p4 }
  0x20   : > { %p1879_p10 = por %p1878_p7, %p1877_p6 }
  0x22   : > { %p1880_p12 = pnand %p1879_p10, %p1873_p3 }
  0x24   : > { %1883 = shalt.err (!%p1880_p12)
}
  0x25   : > { %s1884_s29 = scalar_lea.vmem %s2119_s8, 16384  ;;  %s2017_s30 = smov [#allocation2]  }
  0x26   : > { %p1885_p0 = scmp.ne.s32.totalorder %s2119_s8, %s1884_s29  ;;  %s1889_s4 = sshll.u32 %s2017_s30, 4  ;;  %s1890_s4 = int_to_ptr.vmem [resolvable:$false] %s1889_s4 }
  0x27   : > { %s1891_s5 = scalar_lea.vmem %s1890_s4, 32768  ;;  %p1892_p9 = scmp.lt.s32.totalorder %s2119_s8, %s1890_s4 }
  0x28   : > { %p1887_p2 = pnand %p1885_p0, %p1871_p1  ;;  %p1893_p4 = scmp.lt.s32.totalorder %s1891_s5, %s1884_s29 }
  0x2a   : > { %p1888_p11 = pneg %p1887_p2  ;;  %p1894_p5 = por %p1893_p4, %p1892_p9 }
  0x2c   : > { %p1895_p6 = pnand %p1894_p5, %p1888_p11 }
  0x2e   : > { %1898 = shalt.err (!%p1895_p6)
}
  0x2f   : > { %s2018_s7 = smov 768   ;;  %s2019_s11 = smov 256  }
  0x30   : > { %s2020_s18 = smov 16   ;;  %p1422_p3 = scmp.ge.s32.totalorder %s2015_s17, 1 }
  0x31   : > { %1591 = dma.hbm_to_vmem [thread:$0]  (!%p2123_p13), %s2117_s6, 16384, %s2119_s8, %s169_s10, %s2018_s7, %s2019_s11, %s2020_s18  }
  0x32   : > { %p206_p9 = scmp.lt.s32.totalorder %s2015_s17, 4  ;;  %s1419_s19 = sshll.u32 %s2110_s28, 2 }
  0x33   : > { %s1564_s22 = sshll.u32 %s2011_s16, 6  ;;  %s193_s23 = scalar_lea.vmem [#allocation5], %s1419_s19 }
  0x34   : > { %p2158_p11 = pnand %p1422_p3, %p206_p9  ;;  %s201_s29 = sshll.u32 %s193_s23, 4  ;;  %s202_s29 = int_to_ptr.vmem [resolvable:$true] %s201_s29 }
  0x35   : > { %s2166_s5 = scalar_lea.hbm %s2407_s2, %s1564_s22  ;;  %s190_s6 = scalar_lea.sflag [#allocation6], %s2110_s28 }
  0x36   : > { %s2416_s21 = scalar_select %p2158_p11, 1, 0 }
  0x37   : > { %s1899_s8 = scalar_lea.hbm %s2166_s5, 64  ;;  %s1904_s11 = scalar_lea.hbm %s2407_s2, 192 }
  0x38   : > { %p1900_p7 = scmp.ne.s32.totalorder %s2166_s5, %s1899_s8  ;;  %p1905_p0 = scmp.lt.u32.totalorder %s2166_s5, %s2407_s2 }
  0x39   : > { %p1906_p2 = scmp.lt.u32.totalorder %s1904_s11, %s1899_s8  ;;  %p1908_p5 = scmp.lt.u32.totalorder %s1899_s8, %s2166_s5 }
  0x3a   : > { %p1902_p10 = pnand %p1900_p7, %p1871_p1 }
  0x3b   : > { %p1907_p4 = por %p1906_p2, %p1905_p0 }
  0x3c   : > { %p1903_p12 = pneg %p1902_p10 }
  0x3d   : > { %p1909_p6 = por %p1908_p5, %p1907_p4 }
  0x3f   : > { %p1910_p3 = pnand %p1909_p6, %p1903_p12 }
  0x41   : > { %1913 = shalt.err (!%p1910_p3)
}
  0x42   : > { %s1914_s28 = scalar_lea.vmem %s202_s29, 64  ;;  %s2021_s22 = smov [#allocation5]  }
  0x43   : > { %p1915_p9 = scmp.ne.s32.totalorder %s202_s29, %s1914_s28  ;;  %s1919_s23 = sshll.u32 %s2021_s22, 4  ;;  %s1920_s23 = int_to_ptr.vmem [resolvable:$false] %s1919_s23 }
  0x44   : > { %s1921_s30 = scalar_lea.vmem %s1920_s23, 128  ;;  %p1922_p8 = scmp.lt.s32.totalorder %s202_s29, %s1920_s23 }
  0x45   : > { %p1917_p7 = pnand %p1915_p9, %p1871_p1  ;;  %p1923_p11 = scmp.lt.s32.totalorder %s1921_s30, %s1914_s28 }
  0x47   : > { %p1918_p10 = pneg %p1917_p7  ;;  %p1924_p0 = por %p1923_p11, %p1922_p8 }
  0x49   : > { %p1925_p2 = pnand %p1924_p0, %p1918_p10 }
  0x4b   : > { %1928 = shalt.err (!%p1925_p2)
}
  0x4c   : > { %1594 = dma.hbm_to_vmem [thread:$0]  (!%p2123_p13), %s2166_s5, 64, %s202_s29, %s190_s6  }
  0x4d   : > { %p2417_p12 = scmp.ne.s32.totalorder %s2416_s21, 0 }
  0x4e   : > { %s2191_s4 = sand.u32 (!%p2417_p12), 1, %s1999_s13   ;;  %p2418_p8 = scmp.ne.s32.totalorder (!%p2417_p12), %s2412_s24, 0 }
  0x4f   : > { %210 = sbr.rel (%p2417_p12) target bundleno = 467 (0x1d3), region = 32  ;;  %s1423_s8 = sshll.u32 (!%p2417_p12), %s2191_s4, 10 }
  0x50   : > { %s213_s10 = scalar_lea.sflag (!%p2417_p12), [#allocation3], %s2191_s4  ;;  %s2195_s7 = scalar_lea.vmem (!%p2417_p12), [#allocation2], %s1423_s8 }
  0x56   : > { %1982 = dma.done.wait (%p2418_p8), %s213_s10, 16384  }
  0x57   : > { %1984 = vsyncadd (%p2418_p8), %s213_s10, 4294950912  ;;  %s1424_s9 = sshll.u32 %s2191_s4, 2  ;;  %s222_s21 = scalar_lea.sflag [#allocation6], %s2191_s4 }
  0x58   : > { %s2203_s29 = scalar_lea.vmem [#allocation5], %s1424_s9 }
  0x59   : > { %1986 = dma.done.wait (%p2418_p8), %s222_s21, 64  }
  0x5a   : > { %1988 = vsyncadd (%p2418_p8), %s222_s21, 4294967232  ;;  %v1655_v0 = vld [vmem:[%s2195_s7 + $0x4] ss:$16 sps:$4 sm:$0xff]   ;;  %v1657_v1 = vld [vmem:[%s2195_s7 + $0xc] ss:$16 sps:$4 sm:$0xff]   ;;  %s1425_s23 = sshll.u32 %s2191_s4, 6 }
  0x5b   : > { %1084 = vmatprep.subr.bf16.mxu0 %v1655_v0  ;;  %v1659_v2 = vld [vmem:[%s2195_s7] ss:$16 sps:$4 sm:$0xff]   ;;  %v1660_v3 = vld [vmem:[%s2195_s7 + $0x8] ss:$16 sps:$4 sm:$0xff]   ;;  %1170 = vmatprep.subr.bf16.mxu1 %v1657_v1  ;;  %v1661_v4 = vld [vmem:[%s2195_s7 + $0x24] ss:$16 sps:$4 sm:$0xff]  }
  0x5c   : > { %1085 = vmatpush1.bf16.msra.mxu0 %v1659_v2  ;;  %1171 = vmatpush1.bf16.msra.mxu1 %v1660_v3  ;;  %v1663_v5 = vld [vmem:[%s2195_s7 + $0x2c] ss:$16 sps:$4 sm:$0xff]   ;;  %v1665_v6 = vld [vmem:[%s2195_s7 + $0x20] ss:$16 sps:$4 sm:$0xff]   ;;  %v1666_v7 = vld [vmem:[%s2195_s7 + $0x28] ss:$16 sps:$4 sm:$0xff]  }
  0x5d   : > { %1086 = vmatprep.subr.bf16.mxu0 %v1661_v4  ;;  %1172 = vmatprep.subr.bf16.mxu1 %v1663_v5  ;;  %v1667_v8 = vld [vmem:[%s2195_s7 + $0x44] ss:$16 sps:$4 sm:$0xff]   ;;  %v1669_v9 = vld [vmem:[%s2195_s7 + $0x4c] ss:$16 sps:$4 sm:$0xff]   ;;  %v1671_v10 = vld [vmem:[%s2195_s7 + $0x40] ss:$16 sps:$4 sm:$0xff]  }
  0x5e   : > { %v1672_v11 = vld [vmem:[%s2195_s7 + $0x48] ss:$16 sps:$4 sm:$0xff]   ;;  %v1673_v12 = vld [vmem:[%s2195_s7 + $0x64] ss:$16 sps:$4 sm:$0xff]   ;;  %v1675_v13 = vld [vmem:[%s2195_s7 + $0x6c] ss:$16 sps:$4 sm:$0xff]  }
  0x5f   : > { %v1677_v14 = vld [vmem:[%s2195_s7 + $0x60] ss:$16 sps:$4 sm:$0xff]   ;;  %v1678_v15 = vld [vmem:[%s2195_s7 + $0x68] ss:$16 sps:$4 sm:$0xff]   ;;  %v1679_v16 = vld [vmem:[%s2195_s7 + $0x84] ss:$16 sps:$4 sm:$0xff]  }
  0x60   : > { %1087 = vmatpush1.bf16.msra.mxu0 %v1665_v6  ;;  %1173 = vmatpush1.bf16.msra.mxu1 %v1666_v7  ;;  %v1681_v17 = vld [vmem:[%s2195_s7 + $0x8c] ss:$16 sps:$4 sm:$0xff]   ;;  %v1683_v18 = vld [vmem:[%s2195_s7 + $0x80] ss:$16 sps:$4 sm:$0xff]   ;;  %v1684_v19 = vld [vmem:[%s2195_s7 + $0x88] ss:$16 sps:$4 sm:$0xff]  }
  0x61   : > { %1088 = vmatprep.subr.bf16.mxu0 %v1667_v8  ;;  %1174 = vmatprep.subr.bf16.mxu1 %v1669_v9  ;;  %v1685_v20 = vld [vmem:[%s2195_s7 + $0xa4] ss:$16 sps:$4 sm:$0xff]   ;;  %v1687_v21 = vld [vmem:[%s2195_s7 + $0xac] ss:$16 sps:$4 sm:$0xff]   ;;  %v1689_v22 = vld [vmem:[%s2195_s7 + $0xa0] ss:$16 sps:$4 sm:$0xff]  }
  0x62   : > { %v1690_v23 = vld [vmem:[%s2195_s7 + $0xa8] ss:$16 sps:$4 sm:$0xff]   ;;  %v1691_v24 = vld [vmem:[%s2195_s7 + $0xc4] ss:$16 sps:$4 sm:$0xff]   ;;  %v1693_v25 = vld [vmem:[%s2195_s7 + $0xcc] ss:$16 sps:$4 sm:$0xff]  }
  0x63   : > { %v1695_v26 = vld [vmem:[%s2195_s7 + $0xc0] ss:$16 sps:$4 sm:$0xff]   ;;  %v1696_v27 = vld [vmem:[%s2195_s7 + $0xc8] ss:$16 sps:$4 sm:$0xff]   ;;  %v1697_v28 = vld [vmem:[%s2195_s7 + $0xe4] ss:$16 sps:$4 sm:$0xff]  }
  0x64   : > { %1089 = vmatpush1.bf16.msra.mxu0 %v1671_v10  ;;  %1175 = vmatpush1.bf16.msra.mxu1 %v1672_v11  ;;  %v1699_v29 = vld [vmem:[%s2195_s7 + $0xec] ss:$16 sps:$4 sm:$0xff]   ;;  %v1701_v30 = vld [vmem:[%s2195_s7 + $0xe0] ss:$16 sps:$4 sm:$0xff]   ;;  %v1702_v31 = vld [vmem:[%s2195_s7 + $0xe8] ss:$16 sps:$4 sm:$0xff]  }
  0x65   : > { %1090 = vmatprep.subr.bf16.mxu0 %v1673_v12  ;;  %1176 = vmatprep.subr.bf16.mxu1 %v1675_v13  ;;  %v1703_v32 = vld [vmem:[%s2195_s7 + $0x104] ss:$16 sps:$4 sm:$0xff]   ;;  %v1705_v33 = vld [vmem:[%s2195_s7 + $0x10c] ss:$16 sps:$4 sm:$0xff]   ;;  %v1707_v34 = vld [vmem:[%s2195_s7 + $0x100] ss:$16 sps:$4 sm:$0xff]  }
  0x66   : > { %v1708_v35 = vld [vmem:[%s2195_s7 + $0x108] ss:$16 sps:$4 sm:$0xff]   ;;  %v1709_v36 = vld [vmem:[%s2195_s7 + $0x124] ss:$16 sps:$4 sm:$0xff]   ;;  %v1711_v37 = vld [vmem:[%s2195_s7 + $0x12c] ss:$16 sps:$4 sm:$0xff]  }
  0x67   : > { %v1713_v38 = vld [vmem:[%s2195_s7 + $0x120] ss:$16 sps:$4 sm:$0xff]   ;;  %v1714_v39 = vld [vmem:[%s2195_s7 + $0x128] ss:$16 sps:$4 sm:$0xff]   ;;  %v1715_v40 = vld [vmem:[%s2195_s7 + $0x144] ss:$16 sps:$4 sm:$0xff]  }
  0x68   : > { %1091 = vmatpush1.bf16.msra.mxu0 %v1677_v14  ;;  %1177 = vmatpush1.bf16.msra.mxu1 %v1678_v15  ;;  %v1717_v41 = vld [vmem:[%s2195_s7 + $0x14c] ss:$16 sps:$4 sm:$0xff]   ;;  %v1719_v42 = vld [vmem:[%s2195_s7 + $0x140] ss:$16 sps:$4 sm:$0xff]   ;;  %v1720_v43 = vld [vmem:[%s2195_s7 + $0x148] ss:$16 sps:$4 sm:$0xff]  }
  0x69   : > { %1092 = vmatprep.subr.bf16.mxu0 %v1679_v16  ;;  %1178 = vmatprep.subr.bf16.mxu1 %v1681_v17  ;;  %v1721_v44 = vld [vmem:[%s2195_s7 + $0x164] ss:$16 sps:$4 sm:$0xff]   ;;  %v1723_v45 = vld [vmem:[%s2195_s7 + $0x16c] ss:$16 sps:$4 sm:$0xff]   ;;  %v1725_v46 = vld [vmem:[%s2195_s7 + $0x160] ss:$16 sps:$4 sm:$0xff]  }
  0x6a   : > { %v1726_v47 = vld [vmem:[%s2195_s7 + $0x168] ss:$16 sps:$4 sm:$0xff]   ;;  %v1753_v48 = vld [vmem:[%s2405_s0 + $0x4] ss:$16 sps:$4 sm:$0xff]   ;;  %v1729_v50 = vld [vmem:[%s2195_s7 + $0x18c] ss:$16 sps:$4 sm:$0xff]  }
  0x6b   : > { %v1727_v49 = vld [vmem:[%s2195_s7 + $0x184] ss:$16 sps:$4 sm:$0xff]   ;;  %1116 = vmatprep.mubr.bf16.mxu0 %v1753_v48  ;;  %1202 = vmatprep.mubr.bf16.mxu1 %v1753_v48  ;;  %v1731_v51 = vld [vmem:[%s2195_s7 + $0x180] ss:$16 sps:$4 sm:$0xff]   ;;  %v1732_v52 = vld [vmem:[%s2195_s7 + $0x188] ss:$16 sps:$4 sm:$0xff]  }
  0x6c   : > { %1093 = vmatpush1.bf16.msra.mxu0 %v1683_v18  ;;  %1179 = vmatpush1.bf16.msra.mxu1 %v1684_v19  ;;  %v1733_v53 = vld [vmem:[%s2195_s7 + $0x1a4] ss:$16 sps:$4 sm:$0xff]   ;;  %v1735_v54 = vld [vmem:[%s2195_s7 + $0x1ac] ss:$16 sps:$4 sm:$0xff]   ;;  %v1737_v55 = vld [vmem:[%s2195_s7 + $0x1a0] ss:$16 sps:$4 sm:$0xff]  }
  0x6d   : > { %1094 = vmatprep.subr.bf16.mxu0 %v1685_v20  ;;  %1180 = vmatprep.subr.bf16.mxu1 %v1687_v21  ;;  %v1738_v56 = vld [vmem:[%s2195_s7 + $0x1a8] ss:$16 sps:$4 sm:$0xff]   ;;  %v1739_v57 = vld [vmem:[%s2195_s7 + $0x1c4] ss:$16 sps:$4 sm:$0xff]   ;;  %v1741_v58 = vld [vmem:[%s2195_s7 + $0x1cc] ss:$16 sps:$4 sm:$0xff]  }
  0x6e   : > { %v1743_v59 = vld [vmem:[%s2195_s7 + $0x1c0] ss:$16 sps:$4 sm:$0xff]   ;;  %v1744_v60 = vld [vmem:[%s2195_s7 + $0x1c8] ss:$16 sps:$4 sm:$0xff]   ;;  %v1745_v61 = vld [vmem:[%s2195_s7 + $0x1e4] ss:$16 sps:$4 sm:$0xff]  }
  0x6f   : > { %v1747_v62 = vld [vmem:[%s2195_s7 + $0x1ec] ss:$16 sps:$4 sm:$0xff]   ;;  %v1749_v63 = vld [vmem:[%s2195_s7 + $0x1e0] ss:$16 sps:$4 sm:$0xff]   ;;  %v1750_v0 = vld [vmem:[%s2195_s7 + $0x1e8] ss:$16 sps:$4 sm:$0xff]  }
  0x70   : > { %1095 = vmatpush1.bf16.msra.mxu0 %v1689_v22  ;;  %1181 = vmatpush1.bf16.msra.mxu1 %v1690_v23  ;;  %v1756_v1 = vld [vmem:[%s2195_s7 + $0x204] ss:$16 sps:$4 sm:$0xff]   ;;  %v1759_v2 = vld [vmem:[%s2195_s7 + $0x20c] ss:$16 sps:$4 sm:$0xff]   ;;  %v1751_v3 = vld [vmem:[%s2405_s0] ss:$16 sps:$4 sm:$0xff]  }
  0x71   : > { %1096 = vmatprep.subr.bf16.mxu0 %v1691_v24  ;;  %1182 = vmatprep.subr.bf16.mxu1 %v1693_v25  ;;  %v1754_v4 = vld [vmem:[%s2195_s7 + $0x200] ss:$16 sps:$4 sm:$0xff]   ;;  %v1757_v5 = vld [vmem:[%s2195_s7 + $0x208] ss:$16 sps:$4 sm:$0xff]   ;;  %v1762_v6 = vld [vmem:[%s2195_s7 + $0x224] ss:$16 sps:$4 sm:$0xff]  }
  0x72   : > { %v1765_v7 = vld [vmem:[%s2195_s7 + $0x22c] ss:$16 sps:$4 sm:$0xff]   ;;  %v1760_v8 = vld [vmem:[%s2195_s7 + $0x220] ss:$16 sps:$4 sm:$0xff]   ;;  %v1763_v9 = vld [vmem:[%s2195_s7 + $0x228] ss:$16 sps:$4 sm:$0xff]  }
  0x73   : > { %v1768_v10 = vld [vmem:[%s2195_s7 + $0x244] ss:$16 sps:$4 sm:$0xff]   ;;  %v1771_v11 = vld [vmem:[%s2195_s7 + $0x24c] ss:$16 sps:$4 sm:$0xff]   ;;  %v1766_v12 = vld [vmem:[%s2195_s7 + $0x240] ss:$16 sps:$4 sm:$0xff]  }
  0x74   : > { %1097 = vmatpush1.bf16.msra.mxu0 %v1695_v26  ;;  %1183 = vmatpush1.bf16.msra.mxu1 %v1696_v27  ;;  %v1769_v13 = vld [vmem:[%s2195_s7 + $0x248] ss:$16 sps:$4 sm:$0xff]   ;;  %v1774_v14 = vld [vmem:[%s2195_s7 + $0x264] ss:$16 sps:$4 sm:$0xff]   ;;  %v1777_v15 = vld [vmem:[%s2195_s7 + $0x26c] ss:$16 sps:$4 sm:$0xff]  }
  0x75   : > { %1098 = vmatprep.subr.bf16.mxu0 %v1697_v28  ;;  %1184 = vmatprep.subr.bf16.mxu1 %v1699_v29  ;;  %v1772_v16 = vld [vmem:[%s2195_s7 + $0x260] ss:$16 sps:$4 sm:$0xff]   ;;  %v1775_v17 = vld [vmem:[%s2195_s7 + $0x268] ss:$16 sps:$4 sm:$0xff]   ;;  %v1780_v18 = vld [vmem:[%s2195_s7 + $0x284] ss:$16 sps:$4 sm:$0xff]  }
  0x76   : > { %v1783_v19 = vld [vmem:[%s2195_s7 + $0x28c] ss:$16 sps:$4 sm:$0xff]   ;;  %v1778_v20 = vld [vmem:[%s2195_s7 + $0x280] ss:$16 sps:$4 sm:$0xff]   ;;  %v1781_v21 = vld [vmem:[%s2195_s7 + $0x288] ss:$16 sps:$4 sm:$0xff]  }
  0x77   : > { %v1786_v22 = vld [vmem:[%s2195_s7 + $0x2a4] ss:$16 sps:$4 sm:$0xff]   ;;  %v1789_v23 = vld [vmem:[%s2195_s7 + $0x2ac] ss:$16 sps:$4 sm:$0xff]   ;;  %v1784_v24 = vld [vmem:[%s2195_s7 + $0x2a0] ss:$16 sps:$4 sm:$0xff]  }
  0x78   : > { %1099 = vmatpush1.bf16.msra.mxu0 %v1701_v30  ;;  %1185 = vmatpush1.bf16.msra.mxu1 %v1702_v31  ;;  %v1787_v25 = vld [vmem:[%s2195_s7 + $0x2a8] ss:$16 sps:$4 sm:$0xff]   ;;  %v1792_v26 = vld [vmem:[%s2195_s7 + $0x2c4] ss:$16 sps:$4 sm:$0xff]   ;;  %v1795_v27 = vld [vmem:[%s2195_s7 + $0x2cc] ss:$16 sps:$4 sm:$0xff]  }
  0x79   : > { %1100 = vmatprep.subr.bf16.mxu0 %v1703_v32  ;;  %1186 = vmatprep.subr.bf16.mxu1 %v1705_v33  ;;  %v1852_v28 = vld [vmem:[%s2405_s0 + $0xc] ss:$16 sps:$4 sm:$0xff]   ;;  %v1790_v29 = vld [vmem:[%s2195_s7 + $0x2c0] ss:$16 sps:$4 sm:$0xff]   ;;  %v1793_v30 = vld [vmem:[%s2195_s7 + $0x2c8] ss:$16 sps:$4 sm:$0xff]  }
  0x7a   : > { %v1798_v31 = vld [vmem:[%s2195_s7 + $0x2e4] ss:$16 sps:$4 sm:$0xff]   ;;  %v1801_v32 = vld [vmem:[%s2195_s7 + $0x2ec] ss:$16 sps:$4 sm:$0xff]   ;;  %v1796_v33 = vld [vmem:[%s2195_s7 + $0x2e0] ss:$16 sps:$4 sm:$0xff]  }
  0x7b   : > { %v1825_v48 = vld [vmem:[%s2195_s7 + $0x36c] ss:$16 sps:$4 sm:$0xff]   ;;  %s258_s30 = scalar_lea.vmem [#allocation7], %s1425_s23  ;;  %s1565_s8 = sshll.u32 %s2007_s15, 9 }
  0x7c   : > { %1101 = vmatpush1.bf16.msra.mxu0 %v1707_v34  ;;  %1187 = vmatpush1.bf16.msra.mxu1 %v1708_v35  ;;  %v1799_v34 = vld [vmem:[%s2195_s7 + $0x2e8] ss:$16 sps:$4 sm:$0xff]   ;;  %v1804_v35 = vld [vmem:[%s2195_s7 + $0x304] ss:$16 sps:$4 sm:$0xff]   ;;  %s1289_s10 = sshll.u32 %s258_s30, 4  ;;  %s2355_s21 = scalar_lea.hbm %s2408_s3, %s1565_s8  ;;  %s2357_s10 = int_to_ptr.vmem [resolvable:$true] %s1289_s10 }
  0x7d   : > { %1102 = vmatprep.subr.bf16.mxu0 %v1709_v36  ;;  %1188 = vmatprep.subr.bf16.mxu1 %v1711_v37  ;;  %v1807_v36 = vld [vmem:[%s2195_s7 + $0x30c] ss:$16 sps:$4 sm:$0xff]   ;;  %v1802_v37 = vld [vmem:[%s2195_s7 + $0x300] ss:$16 sps:$4 sm:$0xff]   ;;  %s1273_s15 = scalar_lea.sflag [#allocation4], %s2191_s4  ;;  %p2419_p1 = scmp.ne.s32.totalorder %s2413_s25, 0 }
  0x7e   : > { %s2022_s24 = smov [#allocation7]  }
  0x7f   : > { %s1933_s5 = sshll.u32 %s2022_s24, 4  ;;  %s1934_s5 = int_to_ptr.vmem [resolvable:$false] %s1933_s5 }
  0x80   : > { %1103 = vmatpush1.bf16.msra.mxu0 %v1713_v38  ;;  %1189 = vmatpush1.bf16.msra.mxu1 %v1714_v39  ;;  %v1805_v38 = vld [vmem:[%s2195_s7 + $0x308] ss:$16 sps:$4 sm:$0xff]   ;;  %v1810_v39 = vld [vmem:[%s2195_s7 + $0x324] ss:$16 sps:$4 sm:$0xff]   ;;  %s1935_s6 = scalar_lea.vmem %s1934_s5, 2048  ;;  %p1936_p5 = scmp.lt.s32.totalorder %s2357_s10, %s1934_s5 }
  0x81   : > { %1104 = vmatprep.subr.bf16.mxu0 %v1715_v40  ;;  %1190 = vmatprep.subr.bf16.mxu1 %v1717_v41  ;;  %v1813_v40 = vld [vmem:[%s2195_s7 + $0x32c] ss:$16 sps:$4 sm:$0xff]   ;;  %v1808_v41 = vld [vmem:[%s2195_s7 + $0x320] ss:$16 sps:$4 sm:$0xff]  }
  0x84   : > { %1105 = vmatpush1.bf16.msra.mxu0 %v1719_v42  ;;  %1191 = vmatpush1.bf16.msra.mxu1 %v1720_v43  ;;  %v1811_v42 = vld [vmem:[%s2195_s7 + $0x328] ss:$16 sps:$4 sm:$0xff]   ;;  %v1816_v43 = vld [vmem:[%s2195_s7 + $0x344] ss:$16 sps:$4 sm:$0xff]  }
  0x85   : > { %1106 = vmatprep.subr.bf16.mxu0 %v1721_v44  ;;  %1192 = vmatprep.subr.bf16.mxu1 %v1723_v45  ;;  %v1819_v44 = vld [vmem:[%s2195_s7 + $0x34c] ss:$16 sps:$4 sm:$0xff]   ;;  %v1814_v45 = vld [vmem:[%s2195_s7 + $0x340] ss:$16 sps:$4 sm:$0xff]  }
  0x88   : > { %1107 = vmatpush1.bf16.msra.mxu0 %v1725_v46  ;;  %1193 = vmatpush1.bf16.msra.mxu1 %v1726_v47  ;;  %v1817_v46 = vld [vmem:[%s2195_s7 + $0x348] ss:$16 sps:$4 sm:$0xff]   ;;  %v1822_v47 = vld [vmem:[%s2195_s7 + $0x364] ss:$16 sps:$4 sm:$0xff]  }
  0x89   : > { %1108 = vmatprep.subr.bf16.mxu0 %v1727_v49  ;;  %1194 = vmatprep.subr.bf16.mxu1 %v1729_v50  ;;  %v1820_v49 = vld [vmem:[%s2195_s7 + $0x360] ss:$16 sps:$4 sm:$0xff]   ;;  %v1823_v50 = vld [vmem:[%s2195_s7 + $0x368] ss:$16 sps:$4 sm:$0xff]  }
  0x8c   : > { %1109 = vmatpush1.bf16.msra.mxu0 %v1731_v51  ;;  %1195 = vmatpush1.bf16.msra.mxu1 %v1732_v52  ;;  %v1828_v51 = vld [vmem:[%s2195_s7 + $0x384] ss:$16 sps:$4 sm:$0xff]   ;;  %v1831_v52 = vld [vmem:[%s2195_s7 + $0x38c] ss:$16 sps:$4 sm:$0xff]  }
  0x8d   : > { %1110 = vmatprep.subr.bf16.mxu0 %v1733_v53  ;;  %1196 = vmatprep.subr.bf16.mxu1 %v1735_v54  ;;  %v1826_v53 = vld [vmem:[%s2195_s7 + $0x380] ss:$16 sps:$4 sm:$0xff]   ;;  %v1829_v54 = vld [vmem:[%s2195_s7 + $0x388] ss:$16 sps:$4 sm:$0xff]  }
  0x90   : > { %1111 = vmatpush1.bf16.msra.mxu0 %v1737_v55  ;;  %1197 = vmatpush1.bf16.msra.mxu1 %v1738_v56  ;;  %v1834_v55 = vld [vmem:[%s2195_s7 + $0x3a4] ss:$16 sps:$4 sm:$0xff]   ;;  %v1837_v56 = vld [vmem:[%s2195_s7 + $0x3ac] ss:$16 sps:$4 sm:$0xff]  }
  0x91   : > { %1112 = vmatprep.subr.bf16.mxu0 %v1739_v57  ;;  %1198 = vmatprep.subr.bf16.mxu1 %v1741_v58  ;;  %v1832_v57 = vld [vmem:[%s2195_s7 + $0x3a0] ss:$16 sps:$4 sm:$0xff]   ;;  %v1835_v58 = vld [vmem:[%s2195_s7 + $0x3a8] ss:$16 sps:$4 sm:$0xff]  }
  0x94   : > { %1113 = vmatpush1.bf16.msra.mxu0 %v1743_v59  ;;  %1199 = vmatpush1.bf16.msra.mxu1 %v1744_v60  ;;  %v1840_v59 = vld [vmem:[%s2195_s7 + $0x3c4] ss:$16 sps:$4 sm:$0xff]   ;;  %v1843_v60 = vld [vmem:[%s2195_s7 + $0x3cc] ss:$16 sps:$4 sm:$0xff]  }
  0x95   : > { %1114 = vmatprep.subr.bf16.mxu0 %v1745_v61  ;;  %1200 = vmatprep.subr.bf16.mxu1 %v1747_v62  ;;  %v1838_v61 = vld [vmem:[%s2195_s7 + $0x3c0] ss:$16 sps:$4 sm:$0xff]   ;;  %v1841_v62 = vld [vmem:[%s2195_s7 + $0x3c8] ss:$16 sps:$4 sm:$0xff]  }
  0x98   : > { %1115 = vmatpush1.bf16.msra.mxu0 %v1749_v63  ;;  %1201 = vmatpush1.bf16.msra.mxu1 %v1750_v0  ;;  %v1846_v63 = vld [vmem:[%s2195_s7 + $0x3e4] ss:$16 sps:$4 sm:$0xff]   ;;  %v1849_v0 = vld [vmem:[%s2195_s7 + $0x3ec] ss:$16 sps:$4 sm:$0xff]  }
  0x99   : > { %1127 = vmatprep.subr.bf16.mxu0 %v1756_v1  ;;  %1213 = vmatprep.subr.bf16.mxu1 %v1759_v2  ;;  %v1844_v1 = vld [vmem:[%s2195_s7 + $0x3e0] ss:$16 sps:$4 sm:$0xff]   ;;  %v1847_v2 = vld [vmem:[%s2195_s7 + $0x3e8] ss:$16 sps:$4 sm:$0xff]  }
  0x9b   : > { %1117 = vmatmul.mubr.bf16.vlgmr.msra.gmra.mrb[0].mxu0 %v1751_v3  ;;  %1203 = vmatmul.mubr.bf16.vlgmr.msra.gmra.mrb[0].mxu1 %v1751_v3  ;;  %v1850_v3 = vld [vmem:[%s2405_s0 + $0x8] ss:$16 sps:$4 sm:$0xff]  }
  0x9c   : > { %1128 = vmatpush1.bf16.msra.mxu0 %v1754_v4  ;;  %1214 = vmatpush1.bf16.msra.mxu1 %v1757_v5  ;;  %v404_v4 = vlaneseq }
  0x9d   : > { %1129 = vmatprep.subr.bf16.mxu0 %v1762_v6  ;;  %1215 = vmatprep.subr.bf16.mxu1 %v1765_v7 }
  0x9e   : > { %1159 = vmatprep.mubr.bf16.mxu0 %v1852_v28  ;;  %1245 = vmatprep.mubr.bf16.mxu1 %v1852_v28  ;;  %v405_v5 = vshrl.u32 %v404_v4, 7 }
  0xa0   : > { %1130 = vmatpush1.bf16.msra.mxu0 %v1760_v8  ;;  %1216 = vmatpush1.bf16.msra.mxu1 %v1763_v9  ;;  %v406_v6 = vsub.s32 0, %v405_v5  ;;  %v414_v7 = vsub.s32 2, %v405_v5  ;;  %v402_v8 = vld [vmem:[%s2203_s29] sm:$0xf]  ;;  %v410_v9 = vsub.s32 1, %v405_v5  ;;  %s1929_s29 = scalar_lea.vmem %s2357_s10, 1024 }
  0xa1   : > { %1131 = vmatprep.subr.bf16.mxu0 %v1768_v10  ;;  %1217 = vmatprep.subr.bf16.mxu1 %v1771_v11  ;;  %v418_v10 = vsub.s32 3, %v405_v5  ;;  %p1930_p13 = scmp.ne.s32.totalorder %s2357_s10, %s1929_s29  ;;  %p1937_p6 = scmp.lt.s32.totalorder %s1935_s6, %s1929_s29 }
  0xa2   : > { %v407_v11 = vrot.slane %v402_v8, %v406_v6 }
  0xa3   : > { %p1931_p11 = pnand %p1930_p13, %p2419_p1  ;;  %p1938_p3 = por %p1937_p6, %p1936_p5 }
  0xa4   : > { %1132 = vmatpush1.bf16.msra.mxu0 %v1766_v12  ;;  %1218 = vmatpush1.bf16.msra.mxu1 %v1769_v13  ;;  %v415_v12 = vrot.slane %v402_v8, %v414_v7  ;;  %v411_v13 = vrot.slane %v402_v8, %v410_v9 }
  0xa5   : > { %1133 = vmatprep.subr.bf16.mxu0 %v1774_v14  ;;  %1219 = vmatprep.subr.bf16.mxu1 %v1777_v15  ;;  %v419_v14 = vrot.slane %v402_v8, %v418_v10  ;;  %p1932_p4 = pneg %p1931_p11 }
  0xa7   : > { %p1939_p9 = pnand %p1938_p3, %p1932_p4 }
  0xa8   : > { %1134 = vmatpush1.bf16.msra.mxu0 %v1772_v16  ;;  %1220 = vmatpush1.bf16.msra.mxu1 %v1775_v17 }
  0xa9   : > { %1135 = vmatprep.subr.bf16.mxu0 %v1780_v18  ;;  %1221 = vmatprep.subr.bf16.mxu1 %v1783_v19 }
  0xac   : > { %1136 = vmatpush1.bf16.msra.mxu0 %v1778_v20  ;;  %1222 = vmatpush1.bf16.msra.mxu1 %v1781_v21 }
  0xad   : > { %1137 = vmatprep.subr.bf16.mxu0 %v1786_v22  ;;  %1223 = vmatprep.subr.bf16.mxu1 %v1789_v23 }
  0xb0   : > { %1138 = vmatpush1.bf16.msra.mxu0 %v1784_v24  ;;  %1224 = vmatpush1.bf16.msra.mxu1 %v1787_v25 }
  0xb1   : > { %1139 = vmatprep.subr.bf16.mxu0 %v1792_v26  ;;  %1225 = vmatprep.subr.bf16.mxu1 %v1795_v27 }
  0xb4   : > { %1140 = vmatpush1.bf16.msra.mxu0 %v1790_v29  ;;  %1226 = vmatpush1.bf16.msra.mxu1 %v1793_v30 }
  0xb5   : > { %1141 = vmatprep.subr.bf16.mxu0 %v1798_v31  ;;  %1227 = vmatprep.subr.bf16.mxu1 %v1801_v32 }
  0xb8   : > { %1142 = vmatpush1.bf16.msra.mxu0 %v1796_v33  ;;  %1228 = vmatpush1.bf16.msra.mxu1 %v1799_v34 }
  0xb9   : > { %1143 = vmatprep.subr.bf16.mxu0 %v1804_v35  ;;  %1229 = vmatprep.subr.bf16.mxu1 %v1807_v36 }
  0xbc   : > { %1144 = vmatpush1.bf16.msra.mxu0 %v1802_v37  ;;  %1230 = vmatpush1.bf16.msra.mxu1 %v1805_v38 }
  0xbd   : > { %1145 = vmatprep.subr.bf16.mxu0 %v1810_v39  ;;  %1231 = vmatprep.subr.bf16.mxu1 %v1813_v40 }
  0xc0   : > { %1146 = vmatpush1.bf16.msra.mxu0 %v1808_v41  ;;  %1232 = vmatpush1.bf16.msra.mxu1 %v1811_v42 }
  0xc1   : > { %1147 = vmatprep.subr.bf16.mxu0 %v1816_v43  ;;  %1233 = vmatprep.subr.bf16.mxu1 %v1819_v44 }
  0xc4   : > { %1148 = vmatpush1.bf16.msra.mxu0 %v1814_v45  ;;  %1234 = vmatpush1.bf16.msra.mxu1 %v1817_v46 }
  0xc5   : > { %1149 = vmatprep.subr.bf16.mxu0 %v1822_v47  ;;  %1235 = vmatprep.subr.bf16.mxu1 %v1825_v48 }
  0xc8   : > { %1150 = vmatpush1.bf16.msra.mxu0 %v1820_v49  ;;  %1236 = vmatpush1.bf16.msra.mxu1 %v1823_v50 }
  0xc9   : > { %1151 = vmatprep.subr.bf16.mxu0 %v1828_v51  ;;  %1237 = vmatprep.subr.bf16.mxu1 %v1831_v52 }
  0xcc   : > { %1152 = vmatpush1.bf16.msra.mxu0 %v1826_v53  ;;  %1238 = vmatpush1.bf16.msra.mxu1 %v1829_v54 }
  0xcd   : > { %1153 = vmatprep.subr.bf16.mxu0 %v1834_v55  ;;  %1239 = vmatprep.subr.bf16.mxu1 %v1837_v56 }
  0xd0   : > { %1154 = vmatpush1.bf16.msra.mxu0 %v1832_v57  ;;  %1240 = vmatpush1.bf16.msra.mxu1 %v1835_v58 }
  0xd1   : > { %1155 = vmatprep.subr.bf16.mxu0 %v1840_v59  ;;  %1241 = vmatprep.subr.bf16.mxu1 %v1843_v60 }
  0xd4   : > { %1156 = vmatpush1.bf16.msra.mxu0 %v1838_v61  ;;  %1242 = vmatpush1.bf16.msra.mxu1 %v1841_v62 }
  0xd5   : > { %1157 = vmatprep.subr.bf16.mxu0 %v1846_v63  ;;  %1243 = vmatprep.subr.bf16.mxu1 %v1849_v0 }
  0xd8   : > { %1158 = vmatpush1.bf16.msra.mxu0 %v1844_v1  ;;  %1244 = vmatpush1.bf16.msra.mxu1 %v1847_v2 }
  0xdb   : > { %1160 = vmatmul.mubr.bf16.vlgmr.msra.gmra.mrb[0].mxu0 %v1850_v3  ;;  %1246 = vmatmul.mubr.bf16.vlgmr.msra.gmra.mrb[0].mxu1 %v1850_v3 }
 0x1ae   : > { %v1161_v15 = vpop.f32.mrb[0].mxu0  ;;  %v1247_v16 = vpop.f32.mrb[0].mxu1 }
 0x1af   : > { %v1566_v17 = vadd.f32 %v1161_v15, %v407_v11  ;;  %v1570_v18 = vadd.f32 %v1247_v16, %v415_v12  ;;  %v1163_v19 = vpop.f32.mrb[1].mxu0  ;;  %v1249_v20 = vpop.f32.mrb[1].mxu1 }
 0x1b0   : > { %v1567_v21 = vadd.f32 %v1163_v19, %v411_v13  ;;  %v1571_v22 = vadd.f32 %v1249_v20, %v419_v14  ;;  %v1165_v23 = vpop.f32.mrb[2].mxu0  ;;  %v1251_v24 = vpop.f32.mrb[2].mxu1 }
 0x1b1   : > { %1853 = vtanh.f32 %v1566_v17  ;;  %v1568_v25 = vadd.f32 %v1165_v23, %v407_v11  ;;  %v1167_v26 = vpop.f32.mrb[3].mxu0  ;;  %v1253_v27 = vpop.f32.mrb[3].mxu1  ;;  %v1572_v28 = vadd.f32 %v1251_v24, %v415_v12 }
 0x1b2   : > { %1855 = vtanh.f32 %v1570_v18  ;;  %v1569_v29 = vadd.f32 %v1167_v26, %v411_v13  ;;  %v1573_v30 = vadd.f32 %v1253_v27, %v419_v14 }
 0x1b3   : > { %1857 = vtanh.f32 %v1567_v21 }
 0x1b4   : > { %1859 = vtanh.f32 %v1571_v22 }
 0x1b5   : > { %1861 = vtanh.f32 %v1568_v25 }
 0x1b6   : > { %1863 = vtanh.f32 %v1572_v28 }
 0x1b7   : > { %1865 = vtanh.f32 %v1569_v29 }
 0x1b8   : > { %1867 = vtanh.f32 %v1573_v30 }
 0x1bb   : > { %v1854_v31 = vpop.eup %1853 }
 0x1bc   : > { %v1856_v32 = vpop.eup %1855  ;;  %1264 = vst [vmem:[%s258_s30] sm:$0xff] %v1854_v31 }
 0x1bd   : > { %v1858_v33 = vpop.eup %1857  ;;  %1266 = vst [vmem:[%s258_s30 + $0x10] sm:$0xff] %v1856_v32 }
 0x1be   : > { %v1860_v34 = vpop.eup %1859  ;;  %1265 = vst [vmem:[%s258_s30 + $0x8] sm:$0xff] %v1858_v33 }
 0x1bf   : > { %v1862_v35 = vpop.eup %1861  ;;  %1267 = vst [vmem:[%s258_s30 + $0x18] sm:$0xff] %v1860_v34 }
 0x1c0   : > { %v1864_v36 = vpop.eup %1863  ;;  %1268 = vst [vmem:[%s258_s30 + $0x20] sm:$0xff] %v1862_v35 }
 0x1c1   : > { %v1866_v37 = vpop.eup %1865  ;;  %1270 = vst [vmem:[%s258_s30 + $0x30] sm:$0xff] %v1864_v36 }
 0x1c2   : > { %v1868_v38 = vpop.eup %1867  ;;  %1269 = vst [vmem:[%s258_s30 + $0x28] sm:$0xff] %v1866_v37 }
 0x1c3   : > { %1271 = vst [vmem:[%s258_s30 + $0x38] sm:$0xff] %v1868_v38 }
 0x1c4   : > { %1942 = shalt.err (!%p1939_p9)
}
 0x1c5   : > { %s1943_s11 = scalar_lea.hbm %s2355_s21, 1024  ;;  %s1947_s28 = scalar_lea.hbm %s2408_s3, 3072 }
 0x1c6   : > { %p1944_p7 = scmp.ne.s32.totalorder %s2355_s21, %s1943_s11  ;;  %p1948_p2 = scmp.lt.u32.totalorder %s2355_s21, %s2408_s3 }
 0x1c7   : > { %p1949_p12 = scmp.lt.u32.totalorder %s1947_s28, %s1943_s11  ;;  %p1951_p13 = scmp.lt.u32.totalorder %s1943_s11, %s2355_s21 }
 0x1c8   : > { %p1945_p10 = pnand %p1944_p7, %p2419_p1 }
 0x1c9   : > { %p1950_p8 = por %p1949_p12, %p1948_p2 }
 0x1ca   : > { %p1946_p0 = pneg %p1945_p10 }
 0x1cb   : > { %p1952_p11 = por %p1951_p13, %p1950_p8 }
 0x1cd   : > { %p1953_p4 = pnand %p1952_p11, %p1946_p0 }
 0x1cf   : > { %1956 = shalt.err (!%p1953_p4)
}
 0x1d0   : > { %s2023_s30 = smov 512   ;;  %s2024_s8 = smov 1536  }
 0x1d1   : > { %s2025_s7 = smov 32  }
 0x1d2   : > { %1586 = dma.vmem_to_hbm [thread:$0]  (%p2419_p1), %s2357_s10, 1024, %s2355_s21, %s1273_s15, %s2023_s30, %s2024_s8, %s2025_s7  }
 0x1d3 PF: > { %p1600_p5 = scmp.ge.s32.totalorder %s2015_s17, 2  ;;  %s1304_s9 = sand.u32 1, %s1995_s12  }
 0x1d4   : > { %p2420_p6 = scmp.ne.s32.totalorder %s2414_s27, 0  ;;  %s1305_s29 = scalar_lea.sflag [#allocation4], %s1304_s9 }
 0x1d6   : > { %p1596_p3 = pnand %p1600_p5, %p2420_p6 }
 0x1d8   : > { %1990 = dma.done.wait (!%p1596_p3), %s1305_s29, 1024  }
 0x1d9   : > { %1992 = vsyncadd (!%p1596_p3), %s1305_s29, 4294966272  ;;  %s22_s17 = sadd.s32 1, %s2015_s17   ;;  %s2421_s12 = smov %s1999_s13 }
 0x1da   : > { %p19_p9 = scmp.ge.s32.totalorder %s22_s17, 5   ;;  %s2422_s13 = smov %s2003_s14 }
 0x1db   : > { %s2423_s14 = smov %s2102_s26  ;;  %s2424_s15 = smov %s2011_s16 }
 0x1dc   : > { %s2425_s16 = smov %s2427_s20  ;;  %21 = sbr.rel (!%p19_p9) target bundleno = 8 (0x8), region = 93 }
 0x1e3   :  { %1310 = vsyncpa [#allocation3], 1 }
 0x1e4   :  { %1312 = vsyncpa [#allocation3 + $0x1], 1 }
 0x1e5   :  { %1313 = vsyncpa [#allocation6], 1 }
 0x1e6   :  { %1315 = vsyncpa [#allocation6 + $0x1], 1 }
 0x1e7   :  { %1316 = vsyncpa [#allocation4], 1 }
 0x1e8   :  { %1318 = vsyncpa [#allocation4 + $0x1], 1 }

</bundles_post_ra>
